<compile_context>
chip_gen: v5e
topology: v5e:2x2
jax: 0.10.0
libtpu: 0.0.40
codegen_flags: <defaults>
</compile_context>

<pallas_src>
import functools

import jax
import jax.numpy as jnp
from jax import lax
from jax.experimental import pallas as pl
from jax.experimental.pallas import tpu as pltpu

EPS = 1e-5
LANE = 128


def _round_up(x, m):
    return (x + m - 1) // m * m


# ------------------------------- kernel body --------------------------------
def _dw_conv_kernel(x_hbm, wdw_ref, b1_ref, wpw_ref, b2_ref, o_ref,
                    slab_ref, sem_ref, *, tile_h, w_out, stride):
    """Grid = (batch, row_tile).

    x_hbm   : (N, Hp, Wp, Ci)   padded NHWC input, left in HBM (pl.ANY)
    wdw_ref : (3, 3, Ci)        depthwise weights, BN1 scale folded in
    b1_ref  : (1, Ci)           folded BN1 (+conv1 bias) bias
    wpw_ref : (Ci, Co) bf16     pointwise weights, BN2 scale folded in
    b2_ref  : (1, Co)           folded BN2 (+conv2 bias) bias
    o_ref   : (1, tile_h*W_out, Co)   lane-dense output slab
    slab_ref: (2, tile_in_h, Wp, Ci)  double-buffered input slabs (VMEM scratch)
    sem_ref : (2,)              DMA semaphores, one per slab buffer
    """
    b = pl.program_id(0)
    t = pl.program_id(1)
    n_tiles = pl.num_programs(1)
    slot = t & 1

    tile_in_h = slab_ref.shape[1]
    ci = slab_ref.shape[-1]

    def slab_copy(tile_idx, slot_idx):
        row0 = tile_idx * (tile_h * stride)            # first padded input row
        return pltpu.make_async_copy(
            x_hbm.at[b, pl.ds(row0, tile_in_h)],       # (tile_in_h, Wp, Ci)
            slab_ref.at[slot_idx],
            sem_ref.at[slot_idx])

    # Prime the pipeline for the first row tile of this image.
    @pl.when(t == 0)
    def _():
        slab_copy(0, 0).start()

    # Wait for the slab of the current tile (started here for t==0, otherwise
    # prefetched during the previous grid step).
    slab_copy(t, slot).wait()

    # Prefetch the next row tile of the same image into the other buffer so the
    # DMA overlaps with this tile's compute.
    @pl.when(t + 1 < n_tiles)
    def _():
        slab_copy(t + 1, 1 - slot).start()

    cur = slab_ref.at[slot]
    wdw = wdw_ref[...]                                  # (3, 3, Ci), BN-folded

    # ---- depthwise 3x3 conv: 9 shifted multiply-accumulates on the VPU ----
    acc = jnp.zeros((tile_h, w_out, ci), jnp.float32)
    for kh in range(3):
        for kw in range(3):
            if stride == 1:
                win = cur[pl.ds(kh, tile_h), pl.ds(kw, w_out), :]
            else:
                win = cur[pl.ds(kh, tile_h, stride),
                          pl.ds(kw, w_out, stride), :]
            acc = acc + win * wdw[kh, kw, :]

    # ---- BN1 bias + ReLU, then pointwise 1x1 conv on the MXU (bf16 x bf16,
    #      f32 accumulation).  The (tile_h, W, Ci) -> (tile_h*W, Ci) collapse is
    #      layout-free whenever W_out is a multiple of 8.
    y1 = acc.reshape(tile_h * w_out, ci)
    y1 = jnp.maximum(y1 + b1_ref[...], 0.0).astype(jnp.bfloat16)
    y2 = jnp.dot(y1, wpw_ref[...], preferred_element_type=jnp.float32)

    # ---- BN2 bias + ReLU, lane-dense 2-D store ----
    y2 = jnp.maximum(y2 + b2_ref[...], 0.0)
    o_ref[0] = y2.astype(o_ref.dtype)


# --------------------------------- wrapper ----------------------------------
def _pick_tile_h(h_out, w_out, w_in, ci, co, stride, *, max_tile_h=16,
                 budget_bytes=8 * 1024 * 1024):
    """Largest row tile that keeps the per-step working set under budget."""
    def est(th):
        tile_in_h = (th - 1) * stride + 3
        slab = 2 * tile_in_h * (w_in + 2) * ci * 4          # double-buffered input
        outb = 2 * th * w_out * co * 4                      # double-buffered output
        inter = 2 * th * w_out * (4 * ci + 2 * ci + 4 * co) # acc / y1 / y2 slack
        wts = 2 * (9 * ci * 4 + ci * co * 2 + 4 * (ci + co))
        return slab + outb + inter + wts

    def layout_ok(th):
        return h_out % th == 0 and ((th * w_out) % 8 == 0 or th == h_out)

    caps = (min(max_tile_h, max(h_out // 2, 1)),   # prefer >=2 tiles for overlap
            max_tile_h, h_out)
    for use_budget in (True, False):
        for cap in caps:
            cands = [th for th in range(1, min(cap, h_out) + 1)
                     if layout_ok(th) and (not use_budget or est(th) <= budget_bytes)]
            if cands:
                return max(cands)
    return h_out


def dw_conv_pallas(x_nchw, folded_params, stride, *, max_tile_h=16):
    """x_nchw: (N, C_in, H, W) float32. Returns (N, C_out, H_out, W_out)."""
    wdw_f, b1, wpw_f, b2 = folded_params
    n, c_in, h, w = x_nchw.shape
    c_out = wpw_f.shape[1]
    h_out = (h + 2 - 3) // stride + 1
    w_out = (w + 2 - 3) // stride + 1

    ci = _round_up(c_in, LANE)                 # lane-dense channel padding
    co = _round_up(c_out, LANE)

    tile_h = _pick_tile_h(h_out, w_out, w, ci, co, stride, max_tile_h=max_tile_h)
    n_tiles = h_out // tile_h
    tile_in_h = (tile_h - 1) * stride + 3      # rows + 1-px top/bottom halo

    # One fused wrapper-side prep copy: transpose to NHWC + 1-px spatial halo +
    # channel padding to a multiple of 128.  (No additional HBM round-trips.)
    pad_b = max(0, (h_out - 1) * stride + 2 - h)
    x_nhwc = jnp.transpose(x_nchw, (0, 2, 3, 1))
    xp = jnp.pad(x_nhwc, ((0, 0), (1, pad_b), (1, 1), (0, ci - c_in)))
    hp, wp = h + 1 + pad_b, w + 2

    wdw_p = jnp.pad(wdw_f, ((0, 0), (0, 0), (0, ci - c_in)))
    b1_p = jnp.pad(b1, (0, ci - c_in)).reshape(1, ci)
    wpw_p = jnp.pad(wpw_f, ((0, ci - c_in), (0, co - c_out))).astype(jnp.bfloat16)
    b2_p = jnp.pad(b2, (0, co - c_out)).reshape(1, co)

    kernel = functools.partial(_dw_conv_kernel, tile_h=tile_h, w_out=w_out,
                               stride=stride)

    flops = 2 * n * h_out * w_out * (9 * c_in + c_in * c_out)
    bytes_accessed = (xp.size * 4 + n * h_out * w_out * co * 4
                      + wpw_p.size * 2 + wdw_p.size * 4 + (ci + co) * 8)

    out = pl.pallas_call(
        kernel,
        out_shape=jax.ShapeDtypeStruct((n, h_out * w_out, co), x_nchw.dtype),
        grid_spec=pltpu.PrefetchScalarGridSpec(
            num_scalar_prefetch=0,
            grid=(n, n_tiles),
            in_specs=[
                pl.BlockSpec(memory_space=pl.ANY),                    # x stays in HBM
                pl.BlockSpec((3, 3, ci), lambda b, t: (0, 0, 0)),     # resident weights
                pl.BlockSpec((1, ci), lambda b, t: (0, 0)),
                pl.BlockSpec((ci, co), lambda b, t: (0, 0)),
                pl.BlockSpec((1, co), lambda b, t: (0, 0)),
            ],
            out_specs=pl.BlockSpec((1, tile_h * w_out, co),
                                   lambda b, t: (b, t, 0)),
            scratch_shapes=[
                pltpu.VMEM((2, tile_in_h, wp, ci), jnp.float32),      # input slabs
                pltpu.SemaphoreType.DMA((2,)),
            ],
        ),
        compiler_params=pltpu.CompilerParams(
            dimension_semantics=("parallel", "arbitrary"),
            vmem_limit_bytes=32 * 1024 * 1024),
        cost_estimate=pl.CostEstimate(flops=flops, transcendentals=0,
                                      bytes_accessed=bytes_accessed),
    )(xp, wdw_p, b1_p, wpw_p, b2_p)

    out = out.reshape(n, h_out, w_out, co)[..., :c_out]   # free bitcast + slice
    return jnp.transpose(out, (0, 3, 1, 2))                # back to NCHW


# ----------------------------- parameter setup ------------------------------
def init_params(key, c_in, c_out):
    ks = jax.random.split(key, 10)
    w_dw = jax.random.normal(ks[0], (3, 3, c_in), jnp.float32) * 0.1      # (kh,kw,C)
    b_dw = jax.random.normal(ks[1], (c_in,), jnp.float32) * 0.1
    g1 = 1.0 + 0.1 * jax.random.normal(ks[2], (c_in,), jnp.float32)
    be1 = 0.1 * jax.random.normal(ks[3], (c_in,), jnp.float32)
    m1 = 0.1 * jax.random.normal(ks[4], (c_in,), jnp.float32)
    v1 = jnp.abs(jax.random.normal(ks[5], (c_in,), jnp.float32)) + 0.5

    w_pw = jax.random.normal(ks[6], (c_in, c_out), jnp.float32) * 0.1     # (C_in,C_out)
    b_pw = jax.random.normal(ks[7], (c_out,), jnp.float32) * 0.1
    g2 = 1.0 + 0.1 * jax.random.normal(ks[8], (c_out,), jnp.float32)
    be2 = 0.1 * jax.random.normal(ks[9], (c_out,), jnp.float32)
    m2 = jnp.zeros((c_out,), jnp.float32)
    v2 = jnp.ones((c_out,), jnp.float32)
    return (w_dw, b_dw, g1, be1, m1, v1, w_pw, b_pw, g2, be2, m2, v2)


def fold_params(raw):
    """Fold eval-mode BN (+conv biases) fully into the conv weights/biases."""
    (w_dw, b_dw, g1, be1, m1, v1, w_pw, b_pw, g2, be2, m2, v2) = raw
    s1 = g1 / jnp.sqrt(v1 + EPS)
    wdw_f = w_dw * s1                                   # scale folded into weights
    b1 = be1 + (b_dw - m1) * s1
    s2 = g2 / jnp.sqrt(v2 + EPS)
    wpw_f = w_pw * s2[None, :]
    b2 = be2 + (b_pw - m2) * s2
    return (wdw_f, b1, wpw_f, b2)


# --------------------------- plain-JAX reference ----------------------------
def dw_conv_reference(x_nchw, raw, stride):
    (w_dw, b_dw, g1, be1, m1, v1, w_pw, b_pw, g2, be2, m2, v2) = raw
    x = jnp.transpose(x_nchw, (0, 2, 3, 1))             # NHWC
    c_in = x.shape[-1]
    w_hwio = w_dw.reshape(3, 3, 1, c_in)                # depthwise HWIO
    y = lax.conv_general_dilated(
        x, w_hwio, window_strides=(stride, stride), padding=((1, 1), (1, 1)),
        dimension_numbers=("NHWC", "HWIO", "NHWC"), feature_group_count=c_in)
    y = y + b_dw
    y = (y - m1) / jnp.sqrt(v1 + EPS) * g1 + be1
    y = jnp.maximum(y, 0.0)
    y = jnp.einsum("nhwc,cd->nhwd", y, w_pw) + b_pw
    y = (y - m2) / jnp.sqrt(v2 + EPS) * g2 + be2
    y = jnp.maximum(y, 0.0)
    return jnp.transpose(y, (0, 3, 1, 2))               # NCHW


if __name__ == "__main__":
    key = jax.random.PRNGKey(0)
    k_x, k_p = jax.random.split(key)

    N, C_IN, H, W = 2, 4, 16, 16
    C_OUT, STRIDE = 8, 1

    x = jax.random.normal(k_x, (N, C_IN, H, W), jnp.float32)
    raw = init_params(k_p, C_IN, C_OUT)
    folded = fold_params(raw)

    out = dw_conv_pallas(x, folded, STRIDE)
    out = jax.block_until_ready(out)

    ref = dw_conv_reference(x, raw, STRIDE)
    h_out = (H + 2 - 3) // STRIDE + 1
    w_out = (W + 2 - 3) // STRIDE + 1
    assert out.shape == (N, C_OUT, h_out, w_out)
    # bf16 MXU operands (f32 accumulation) -> slightly looser tolerance than f32.
    assert jnp.allclose(out, ref, atol=2e-2, rtol=2e-2), "mismatch vs reference"

    print("KERNEL_OK")
</pallas_src>

<mosaic_0001>
module attributes {stable_mosaic.version = 11 : i64} {
  func.func @_dw_conv_kernel(%arg0: i32, %arg1: i32, %arg2: memref<2x18x18x128xf32, #tpu.memory_space<any>>, %arg3: memref<3x3x128xf32, #tpu.memory_space<vmem>>, %arg4: memref<1x128xf32, #tpu.memory_space<vmem>>, %arg5: memref<128x128xbf16, #tpu.memory_space<vmem>>, %arg6: memref<1x128xf32, #tpu.memory_space<vmem>>, %arg7: memref<1x128x128xf32, #tpu.memory_space<vmem>>, %arg8: memref<2x10x18x128xf32, #tpu.memory_space<vmem>>, %arg9: memref<2x!tpu.dma_semaphore, #tpu.memory_space<semaphore_mem>>) attributes {dimension_semantics = [#tpu.dimension_semantics<parallel>, #tpu.dimension_semantics<arbitrary>], iteration_bounds = array<i64: 2, 2>, scalar_prefetch = 0 : i64, scratch_operands = 2 : i64, tpu.core_type = #tpu.core_type<tc>, window_params = [{}, {pipeline_mode = #tpu.pipeline_mode<synchronous>, transform_indices = @transform_1, window_bounds = array<i64: 3, 3, 128>}, {pipeline_mode = #tpu.pipeline_mode<synchronous>, transform_indices = @transform_2, window_bounds = array<i64: 1, 128>}, {pipeline_mode = #tpu.pipeline_mode<synchronous>, transform_indices = @transform_3, window_bounds = array<i64: 128, 128>}, {pipeline_mode = #tpu.pipeline_mode<synchronous>, transform_indices = @transform_4, window_bounds = array<i64: 1, 128>}, {transform_indices = @transform_5, window_bounds = array<i64: 1, 128, 128>}]} {
    %c1_i32 = arith.constant 1 : i32
    %0 = arith.andi %arg1, %c1_i32 : i32
    %c0_i32 = arith.constant 0 : i32
    %1 = arith.cmpi eq, %arg1, %c0_i32 : i32
    %2 = arith.extui %1 : i1 to i32
    %c0_i32_0 = arith.constant 0 : i32
    %3 = arith.cmpi ne, %2, %c0_i32_0 : i32
    scf.if %3 {
      %c0_i32_74 = arith.constant 0 : i32
      %c0_i32_75 = arith.constant 0 : i32
      %c0_i32_76 = arith.constant 0 : i32
      %c0_i32_77 = arith.constant 0 : i32
      %c0_i32_78 = arith.constant 0 : i32
      %115 = tpu.memref_slice %arg2[%arg0, %c0_i32_76, %c0_i32_77, %c0_i32_78] : memref<2x18x18x128xf32, #tpu.memory_space<any>> -> memref<1x10x18x128xf32, #tpu.memory_space<any>>
      %116 = tpu.memref_squeeze %115 : memref<1x10x18x128xf32, #tpu.memory_space<any>> -> memref<10x18x128xf32, #tpu.memory_space<any>>
      %c0_i32_79 = arith.constant 0 : i32
      %c0_i32_80 = arith.constant 0 : i32
      %c0_i32_81 = arith.constant 0 : i32
      %117 = tpu.memref_slice %arg8[%c0_i32_74, %c0_i32_79, %c0_i32_80, %c0_i32_81] : memref<2x10x18x128xf32, #tpu.memory_space<vmem>> -> memref<1x10x18x128xf32, #tpu.memory_space<vmem>>
      %118 = tpu.memref_squeeze %117 : memref<1x10x18x128xf32, #tpu.memory_space<vmem>> -> memref<10x18x128xf32, #tpu.memory_space<vmem>>
      %119 = tpu.memref_slice %arg9[%c0_i32_75] : memref<2x!tpu.dma_semaphore, #tpu.memory_space<semaphore_mem>> -> memref<1x!tpu.dma_semaphore, #tpu.memory_space<semaphore_mem>>
      %120 = tpu.memref_squeeze %119 : memref<1x!tpu.dma_semaphore, #tpu.memory_space<semaphore_mem>> -> memref<!tpu.dma_semaphore, #tpu.memory_space<semaphore_mem>>
      tpu.enqueue_dma source(%116 : memref<10x18x128xf32, #tpu.memory_space<any>>) target(%118 : memref<10x18x128xf32, #tpu.memory_space<vmem>>) target_semaphore(%120 : memref<!tpu.dma_semaphore, #tpu.memory_space<semaphore_mem>>)
    } else {
    }
    %c8_i32 = arith.constant 8 : i32
    %4 = arith.muli %arg1, %c8_i32 : i32
    %c0_i32_1 = arith.constant 0 : i32
    %c0_i32_2 = arith.constant 0 : i32
    %5 = tpu.memref_slice %arg2[%arg0, %4, %c0_i32_1, %c0_i32_2] : memref<2x18x18x128xf32, #tpu.memory_space<any>> -> memref<1x10x18x128xf32, #tpu.memory_space<any>>
    %6 = tpu.memref_squeeze %5 : memref<1x10x18x128xf32, #tpu.memory_space<any>> -> memref<10x18x128xf32, #tpu.memory_space<any>>
    %c0_i32_3 = arith.constant 0 : i32
    %c0_i32_4 = arith.constant 0 : i32
    %c0_i32_5 = arith.constant 0 : i32
    %7 = tpu.memref_slice %arg8[%0, %c0_i32_3, %c0_i32_4, %c0_i32_5] : memref<2x10x18x128xf32, #tpu.memory_space<vmem>> -> memref<1x10x18x128xf32, #tpu.memory_space<vmem>>
    %8 = tpu.memref_squeeze %7 : memref<1x10x18x128xf32, #tpu.memory_space<vmem>> -> memref<10x18x128xf32, #tpu.memory_space<vmem>>
    %9 = tpu.memref_slice %arg9[%0] : memref<2x!tpu.dma_semaphore, #tpu.memory_space<semaphore_mem>> -> memref<1x!tpu.dma_semaphore, #tpu.memory_space<semaphore_mem>>
    %10 = tpu.memref_squeeze %9 : memref<1x!tpu.dma_semaphore, #tpu.memory_space<semaphore_mem>> -> memref<!tpu.dma_semaphore, #tpu.memory_space<semaphore_mem>>
    tpu.wait_dma2 semaphore(%10 : memref<!tpu.dma_semaphore, #tpu.memory_space<semaphore_mem>>) src(%6 : memref<10x18x128xf32, #tpu.memory_space<any>>) dst(%8 : memref<10x18x128xf32, #tpu.memory_space<vmem>>)
    %c1_i32_6 = arith.constant 1 : i32
    %11 = arith.addi %arg1, %c1_i32_6 : i32
    %c2_i32 = arith.constant 2 : i32
    %12 = arith.cmpi slt, %11, %c2_i32 : i32
    %13 = arith.extui %12 : i1 to i32
    %c0_i32_7 = arith.constant 0 : i32
    %14 = arith.cmpi ne, %13, %c0_i32_7 : i32
    scf.if %14 {
      %c1_i32_74 = arith.constant 1 : i32
      %115 = arith.addi %arg1, %c1_i32_74 : i32
      %c1_i32_75 = arith.constant 1 : i32
      %116 = arith.subi %c1_i32_75, %0 : i32
      %c8_i32_76 = arith.constant 8 : i32
      %117 = arith.muli %115, %c8_i32_76 : i32
      %c0_i32_77 = arith.constant 0 : i32
      %c0_i32_78 = arith.constant 0 : i32
      %118 = tpu.memref_slice %arg2[%arg0, %117, %c0_i32_77, %c0_i32_78] : memref<2x18x18x128xf32, #tpu.memory_space<any>> -> memref<1x10x18x128xf32, #tpu.memory_space<any>>
      %119 = tpu.memref_squeeze %118 : memref<1x10x18x128xf32, #tpu.memory_space<any>> -> memref<10x18x128xf32, #tpu.memory_space<any>>
      %c0_i32_79 = arith.constant 0 : i32
      %c0_i32_80 = arith.constant 0 : i32
      %c0_i32_81 = arith.constant 0 : i32
      %120 = tpu.memref_slice %arg8[%116, %c0_i32_79, %c0_i32_80, %c0_i32_81] : memref<2x10x18x128xf32, #tpu.memory_space<vmem>> -> memref<1x10x18x128xf32, #tpu.memory_space<vmem>>
      %121 = tpu.memref_squeeze %120 : memref<1x10x18x128xf32, #tpu.memory_space<vmem>> -> memref<10x18x128xf32, #tpu.memory_space<vmem>>
      %122 = tpu.memref_slice %arg9[%116] : memref<2x!tpu.dma_semaphore, #tpu.memory_space<semaphore_mem>> -> memref<1x!tpu.dma_semaphore, #tpu.memory_space<semaphore_mem>>
      %123 = tpu.memref_squeeze %122 : memref<1x!tpu.dma_semaphore, #tpu.memory_space<semaphore_mem>> -> memref<!tpu.dma_semaphore, #tpu.memory_space<semaphore_mem>>
      tpu.enqueue_dma source(%119 : memref<10x18x128xf32, #tpu.memory_space<any>>) target(%121 : memref<10x18x128xf32, #tpu.memory_space<vmem>>) target_semaphore(%123 : memref<!tpu.dma_semaphore, #tpu.memory_space<semaphore_mem>>)
    } else {
    }
    %c0 = arith.constant 0 : index
    %c0_8 = arith.constant 0 : index
    %c0_9 = arith.constant 0 : index
    %15 = vector.load %arg3[%c0, %c0_8, %c0_9] : memref<3x3x128xf32, #tpu.memory_space<vmem>>, vector<3x3x128xf32>
    %cst = arith.constant 0.000000e+00 : f32
    %16 = vector.broadcast %cst : f32 to vector<8x16x128xf32>
    %c0_i32_10 = arith.constant 0 : i32
    %c0_i32_11 = arith.constant 0 : i32
    %c0_i32_12 = arith.constant 0 : i32
    %17 = tpu.memref_slice %arg8[%0, %c0_i32_10, %c0_i32_11, %c0_i32_12] : memref<2x10x18x128xf32, #tpu.memory_space<vmem>> -> memref<1x10x18x128xf32, #tpu.memory_space<vmem>>
    %18 = tpu.memref_squeeze %17 : memref<1x10x18x128xf32, #tpu.memory_space<vmem>> -> memref<10x18x128xf32, #tpu.memory_space<vmem>>
    %c0_13 = arith.constant 0 : index
    %c0_14 = arith.constant 0 : index
    %c0_15 = arith.constant 0 : index
    %19 = vector.load %18[%c0_13, %c0_14, %c0_15] : memref<10x18x128xf32, #tpu.memory_space<vmem>>, vector<8x16x128xf32>
    %20 = vector.extract_strided_slice %15 {offsets = [0, 0, 0], sizes = [1, 1, 128], strides = [1, 1, 1]} : vector<3x3x128xf32> to vector<1x1x128xf32>
    %21 = vector.shape_cast %20 : vector<1x1x128xf32> to vector<128xf32>
    %22 = vector.shape_cast %21 : vector<128xf32> to vector<1x1x128xf32>
    %23 = vector.broadcast %22 : vector<1x1x128xf32> to vector<8x16x128xf32>
    %24 = arith.mulf %19, %23 : vector<8x16x128xf32>
    %25 = arith.addf %16, %24 : vector<8x16x128xf32>
    %c0_i32_16 = arith.constant 0 : i32
    %c0_i32_17 = arith.constant 0 : i32
    %c0_i32_18 = arith.constant 0 : i32
    %26 = tpu.memref_slice %arg8[%0, %c0_i32_16, %c0_i32_17, %c0_i32_18] : memref<2x10x18x128xf32, #tpu.memory_space<vmem>> -> memref<1x10x18x128xf32, #tpu.memory_space<vmem>>
    %27 = tpu.memref_squeeze %26 : memref<1x10x18x128xf32, #tpu.memory_space<vmem>> -> memref<10x18x128xf32, #tpu.memory_space<vmem>>
    %c0_19 = arith.constant 0 : index
    %c1 = arith.constant 1 : index
    %c0_20 = arith.constant 0 : index
    %28 = vector.load %27[%c0_19, %c1, %c0_20] : memref<10x18x128xf32, #tpu.memory_space<vmem>>, vector<8x16x128xf32>
    %29 = vector.extract_strided_slice %15 {offsets = [0, 1, 0], sizes = [1, 1, 128], strides = [1, 1, 1]} : vector<3x3x128xf32> to vector<1x1x128xf32>
    %30 = vector.shape_cast %29 : vector<1x1x128xf32> to vector<128xf32>
    %31 = vector.shape_cast %30 : vector<128xf32> to vector<1x1x128xf32>
    %32 = vector.broadcast %31 : vector<1x1x128xf32> to vector<8x16x128xf32>
    %33 = arith.mulf %28, %32 : vector<8x16x128xf32>
    %34 = arith.addf %25, %33 : vector<8x16x128xf32>
    %c0_i32_21 = arith.constant 0 : i32
    %c0_i32_22 = arith.constant 0 : i32
    %c0_i32_23 = arith.constant 0 : i32
    %35 = tpu.memref_slice %arg8[%0, %c0_i32_21, %c0_i32_22, %c0_i32_23] : memref<2x10x18x128xf32, #tpu.memory_space<vmem>> -> memref<1x10x18x128xf32, #tpu.memory_space<vmem>>
    %36 = tpu.memref_squeeze %35 : memref<1x10x18x128xf32, #tpu.memory_space<vmem>> -> memref<10x18x128xf32, #tpu.memory_space<vmem>>
    %c0_24 = arith.constant 0 : index
    %c2 = arith.constant 2 : index
    %c0_25 = arith.constant 0 : index
    %37 = vector.load %36[%c0_24, %c2, %c0_25] : memref<10x18x128xf32, #tpu.memory_space<vmem>>, vector<8x16x128xf32>
    %38 = vector.extract_strided_slice %15 {offsets = [0, 2, 0], sizes = [1, 1, 128], strides = [1, 1, 1]} : vector<3x3x128xf32> to vector<1x1x128xf32>
    %39 = vector.shape_cast %38 : vector<1x1x128xf32> to vector<128xf32>
    %40 = vector.shape_cast %39 : vector<128xf32> to vector<1x1x128xf32>
    %41 = vector.broadcast %40 : vector<1x1x128xf32> to vector<8x16x128xf32>
    %42 = arith.mulf %37, %41 : vector<8x16x128xf32>
    %43 = arith.addf %34, %42 : vector<8x16x128xf32>
    %c0_i32_26 = arith.constant 0 : i32
    %c0_i32_27 = arith.constant 0 : i32
    %c0_i32_28 = arith.constant 0 : i32
    %44 = tpu.memref_slice %arg8[%0, %c0_i32_26, %c0_i32_27, %c0_i32_28] : memref<2x10x18x128xf32, #tpu.memory_space<vmem>> -> memref<1x10x18x128xf32, #tpu.memory_space<vmem>>
    %45 = tpu.memref_squeeze %44 : memref<1x10x18x128xf32, #tpu.memory_space<vmem>> -> memref<10x18x128xf32, #tpu.memory_space<vmem>>
    %c1_29 = arith.constant 1 : index
    %c0_30 = arith.constant 0 : index
    %c0_31 = arith.constant 0 : index
    %46 = vector.load %45[%c1_29, %c0_30, %c0_31] : memref<10x18x128xf32, #tpu.memory_space<vmem>>, vector<8x16x128xf32>
    %47 = vector.extract_strided_slice %15 {offsets = [1, 0, 0], sizes = [1, 1, 128], strides = [1, 1, 1]} : vector<3x3x128xf32> to vector<1x1x128xf32>
    %48 = vector.shape_cast %47 : vector<1x1x128xf32> to vector<128xf32>
    %49 = vector.shape_cast %48 : vector<128xf32> to vector<1x1x128xf32>
    %50 = vector.broadcast %49 : vector<1x1x128xf32> to vector<8x16x128xf32>
    %51 = arith.mulf %46, %50 : vector<8x16x128xf32>
    %52 = arith.addf %43, %51 : vector<8x16x128xf32>
    %c0_i32_32 = arith.constant 0 : i32
    %c0_i32_33 = arith.constant 0 : i32
    %c0_i32_34 = arith.constant 0 : i32
    %53 = tpu.memref_slice %arg8[%0, %c0_i32_32, %c0_i32_33, %c0_i32_34] : memref<2x10x18x128xf32, #tpu.memory_space<vmem>> -> memref<1x10x18x128xf32, #tpu.memory_space<vmem>>
    %54 = tpu.memref_squeeze %53 : memref<1x10x18x128xf32, #tpu.memory_space<vmem>> -> memref<10x18x128xf32, #tpu.memory_space<vmem>>
    %c1_35 = arith.constant 1 : index
    %c1_36 = arith.constant 1 : index
    %c0_37 = arith.constant 0 : index
    %55 = vector.load %54[%c1_35, %c1_36, %c0_37] : memref<10x18x128xf32, #tpu.memory_space<vmem>>, vector<8x16x128xf32>
    %56 = vector.extract_strided_slice %15 {offsets = [1, 1, 0], sizes = [1, 1, 128], strides = [1, 1, 1]} : vector<3x3x128xf32> to vector<1x1x128xf32>
    %57 = vector.shape_cast %56 : vector<1x1x128xf32> to vector<128xf32>
    %58 = vector.shape_cast %57 : vector<128xf32> to vector<1x1x128xf32>
    %59 = vector.broadcast %58 : vector<1x1x128xf32> to vector<8x16x128xf32>
    %60 = arith.mulf %55, %59 : vector<8x16x128xf32>
    %61 = arith.addf %52, %60 : vector<8x16x128xf32>
    %c0_i32_38 = arith.constant 0 : i32
    %c0_i32_39 = arith.constant 0 : i32
    %c0_i32_40 = arith.constant 0 : i32
    %62 = tpu.memref_slice %arg8[%0, %c0_i32_38, %c0_i32_39, %c0_i32_40] : memref<2x10x18x128xf32, #tpu.memory_space<vmem>> -> memref<1x10x18x128xf32, #tpu.memory_space<vmem>>
    %63 = tpu.memref_squeeze %62 : memref<1x10x18x128xf32, #tpu.memory_space<vmem>> -> memref<10x18x128xf32, #tpu.memory_space<vmem>>
    %c1_41 = arith.constant 1 : index
    %c2_42 = arith.constant 2 : index
    %c0_43 = arith.constant 0 : index
    %64 = vector.load %63[%c1_41, %c2_42, %c0_43] : memref<10x18x128xf32, #tpu.memory_space<vmem>>, vector<8x16x128xf32>
    %65 = vector.extract_strided_slice %15 {offsets = [1, 2, 0], sizes = [1, 1, 128], strides = [1, 1, 1]} : vector<3x3x128xf32> to vector<1x1x128xf32>
    %66 = vector.shape_cast %65 : vector<1x1x128xf32> to vector<128xf32>
    %67 = vector.shape_cast %66 : vector<128xf32> to vector<1x1x128xf32>
    %68 = vector.broadcast %67 : vector<1x1x128xf32> to vector<8x16x128xf32>
    %69 = arith.mulf %64, %68 : vector<8x16x128xf32>
    %70 = arith.addf %61, %69 : vector<8x16x128xf32>
    %c0_i32_44 = arith.constant 0 : i32
    %c0_i32_45 = arith.constant 0 : i32
    %c0_i32_46 = arith.constant 0 : i32
    %71 = tpu.memref_slice %arg8[%0, %c0_i32_44, %c0_i32_45, %c0_i32_46] : memref<2x10x18x128xf32, #tpu.memory_space<vmem>> -> memref<1x10x18x128xf32, #tpu.memory_space<vmem>>
    %72 = tpu.memref_squeeze %71 : memref<1x10x18x128xf32, #tpu.memory_space<vmem>> -> memref<10x18x128xf32, #tpu.memory_space<vmem>>
    %c2_47 = arith.constant 2 : index
    %c0_48 = arith.constant 0 : index
    %c0_49 = arith.constant 0 : index
    %73 = vector.load %72[%c2_47, %c0_48, %c0_49] : memref<10x18x128xf32, #tpu.memory_space<vmem>>, vector<8x16x128xf32>
    %74 = vector.extract_strided_slice %15 {offsets = [2, 0, 0], sizes = [1, 1, 128], strides = [1, 1, 1]} : vector<3x3x128xf32> to vector<1x1x128xf32>
    %75 = vector.shape_cast %74 : vector<1x1x128xf32> to vector<128xf32>
    %76 = vector.shape_cast %75 : vector<128xf32> to vector<1x1x128xf32>
    %77 = vector.broadcast %76 : vector<1x1x128xf32> to vector<8x16x128xf32>
    %78 = arith.mulf %73, %77 : vector<8x16x128xf32>
    %79 = arith.addf %70, %78 : vector<8x16x128xf32>
    %c0_i32_50 = arith.constant 0 : i32
    %c0_i32_51 = arith.constant 0 : i32
    %c0_i32_52 = arith.constant 0 : i32
    %80 = tpu.memref_slice %arg8[%0, %c0_i32_50, %c0_i32_51, %c0_i32_52] : memref<2x10x18x128xf32, #tpu.memory_space<vmem>> -> memref<1x10x18x128xf32, #tpu.memory_space<vmem>>
    %81 = tpu.memref_squeeze %80 : memref<1x10x18x128xf32, #tpu.memory_space<vmem>> -> memref<10x18x128xf32, #tpu.memory_space<vmem>>
    %c2_53 = arith.constant 2 : index
    %c1_54 = arith.constant 1 : index
    %c0_55 = arith.constant 0 : index
    %82 = vector.load %81[%c2_53, %c1_54, %c0_55] : memref<10x18x128xf32, #tpu.memory_space<vmem>>, vector<8x16x128xf32>
    %83 = vector.extract_strided_slice %15 {offsets = [2, 1, 0], sizes = [1, 1, 128], strides = [1, 1, 1]} : vector<3x3x128xf32> to vector<1x1x128xf32>
    %84 = vector.shape_cast %83 : vector<1x1x128xf32> to vector<128xf32>
    %85 = vector.shape_cast %84 : vector<128xf32> to vector<1x1x128xf32>
    %86 = vector.broadcast %85 : vector<1x1x128xf32> to vector<8x16x128xf32>
    %87 = arith.mulf %82, %86 : vector<8x16x128xf32>
    %88 = arith.addf %79, %87 : vector<8x16x128xf32>
    %c0_i32_56 = arith.constant 0 : i32
    %c0_i32_57 = arith.constant 0 : i32
    %c0_i32_58 = arith.constant 0 : i32
    %89 = tpu.memref_slice %arg8[%0, %c0_i32_56, %c0_i32_57, %c0_i32_58] : memref<2x10x18x128xf32, #tpu.memory_space<vmem>> -> memref<1x10x18x128xf32, #tpu.memory_space<vmem>>
    %90 = tpu.memref_squeeze %89 : memref<1x10x18x128xf32, #tpu.memory_space<vmem>> -> memref<10x18x128xf32, #tpu.memory_space<vmem>>
    %c2_59 = arith.constant 2 : index
    %c2_60 = arith.constant 2 : index
    %c0_61 = arith.constant 0 : index
    %91 = vector.load %90[%c2_59, %c2_60, %c0_61] : memref<10x18x128xf32, #tpu.memory_space<vmem>>, vector<8x16x128xf32>
    %92 = vector.extract_strided_slice %15 {offsets = [2, 2, 0], sizes = [1, 1, 128], strides = [1, 1, 1]} : vector<3x3x128xf32> to vector<1x1x128xf32>
    %93 = vector.shape_cast %92 : vector<1x1x128xf32> to vector<128xf32>
    %94 = vector.shape_cast %93 : vector<128xf32> to vector<1x1x128xf32>
    %95 = vector.broadcast %94 : vector<1x1x128xf32> to vector<8x16x128xf32>
    %96 = arith.mulf %91, %95 : vector<8x16x128xf32>
    %97 = arith.addf %88, %96 : vector<8x16x128xf32>
    %98 = vector.shape_cast %97 : vector<8x16x128xf32> to vector<128x128xf32>
    %c0_62 = arith.constant 0 : index
    %c0_63 = arith.constant 0 : index
    %99 = vector.load %arg4[%c0_62, %c0_63] : memref<1x128xf32, #tpu.memory_space<vmem>>, vector<1x128xf32>
    %100 = vector.broadcast %99 : vector<1x128xf32> to vector<128x128xf32>
    %101 = arith.addf %98, %100 : vector<128x128xf32>
    %cst_64 = arith.constant 0.000000e+00 : f32
    %102 = vector.broadcast %cst_64 : f32 to vector<128x128xf32>
    %103 = arith.maximumf %101, %102 : vector<128x128xf32>
    %104 = arith.truncf %103 : vector<128x128xf32> to vector<128x128xbf16>
    %c0_65 = arith.constant 0 : index
    %c0_66 = arith.constant 0 : index
    %105 = vector.load %arg5[%c0_65, %c0_66] : memref<128x128xbf16, #tpu.memory_space<vmem>>, vector<128x128xbf16>
    %cst_67 = arith.constant dense<0.000000e+00> : vector<128x128xf32>
    %106 = tpu.matmul %104, %105, %cst_67 {dimension_numbers = #tpu.dot_dimension_numbers<[1], [0], [0], [1], [0, 0, 1, 1], [], []>} : vector<128x128xbf16>, vector<128x128xbf16>, vector<128x128xf32> -> vector<128x128xf32>
    %c0_68 = arith.constant 0 : index
    %c0_69 = arith.constant 0 : index
    %107 = vector.load %arg6[%c0_68, %c0_69] : memref<1x128xf32, #tpu.memory_space<vmem>>, vector<1x128xf32>
    %108 = vector.broadcast %107 : vector<1x128xf32> to vector<128x128xf32>
    %109 = arith.addf %106, %108 : vector<128x128xf32>
    %cst_70 = arith.constant 0.000000e+00 : f32
    %110 = vector.broadcast %cst_70 : f32 to vector<128x128xf32>
    %111 = arith.maximumf %109, %110 : vector<128x128xf32>
    %c0_71 = arith.constant 0 : index
    %c0_72 = arith.constant 0 : index
    %c0_73 = arith.constant 0 : index
    %112 = vector.load %arg7[%c0_71, %c0_72, %c0_73] : memref<1x128x128xf32, #tpu.memory_space<vmem>>, vector<1x128x128xf32>
    %113 = vector.shape_cast %112 : vector<1x128x128xf32> to vector<128x128xf32>
    %114 = vector.shape_cast %111 : vector<128x128xf32> to vector<1x128x128xf32>
    tpu.vector_store %arg7[%c0_71, %c0_72, %c0_73], %114 {strides = array<i32>} : memref<1x128x128xf32, #tpu.memory_space<vmem>>, vector<1x128x128xf32>,
    return
  }
  func.func @transform_1(%arg0: i32, %arg1: i32) -> (i32, i32, i32) {
    %c0_i32 = arith.constant 0 : i32
    %c0_i32_0 = arith.constant 0 : i32
    %c0_i32_1 = arith.constant 0 : i32
    %c0_i32_2 = arith.constant 0 : i32
    return %c0_i32, %c0_i32_0, %c0_i32_1 : i32, i32, i32
  }
  func.func @transform_2(%arg0: i32, %arg1: i32) -> (i32, i32) {
    %c0_i32 = arith.constant 0 : i32
    %c0_i32_0 = arith.constant 0 : i32
    %c0_i32_1 = arith.constant 0 : i32
    return %c0_i32, %c0_i32_0 : i32, i32
  }
  func.func @transform_3(%arg0: i32, %arg1: i32) -> (i32, i32) {
    %c0_i32 = arith.constant 0 : i32
    %c0_i32_0 = arith.constant 0 : i32
    %c0_i32_1 = arith.constant 0 : i32
    return %c0_i32, %c0_i32_0 : i32, i32
  }
  func.func @transform_4(%arg0: i32, %arg1: i32) -> (i32, i32) {
    %c0_i32 = arith.constant 0 : i32
    %c0_i32_0 = arith.constant 0 : i32
    %c0_i32_1 = arith.constant 0 : i32
    return %c0_i32, %c0_i32_0 : i32, i32
  }
  func.func @transform_5(%arg0: i32, %arg1: i32) -> (i32, i32, i32) {
    %c0_i32 = arith.constant 0 : i32
    %c0_i32_0 = arith.constant 0 : i32
    return %arg0, %arg1, %c0_i32 : i32, i32, i32
  }
}

</mosaic_0001>

<bundles_post_ra>
// kernel: tpu_custom_call.1
= control target key start
LH: loop header
LB: loop body
LE: loop exit
PB: predicated region body
PF: predicated region fallthrough
CT: control target
= control target key end

     0   :  { %10 = vsyncpa [#allocation5], 0  ;;  %s2368_s0 = inlined_call_operand.vmem [shape: f32[2,18,18,128], index: 0, kind: input, shape index: {}]   ;;  %s2369_s1 = inlined_call_operand.vmem [shape: f32[3,3,128], index: 1, kind: input, shape index: {}]   ;;  %s2370_s2 = inlined_call_operand.vmem [shape: f32[1,128], index: 2, kind: input, shape index: {}]   ;;  %s2371_s3 = inlined_call_operand.vmem [shape: bf16[128,128], index: 3, kind: input, shape index: {}]   ;;  %s2372_s4 = inlined_call_operand.vmem [shape: f32[1,128], index: 4, kind: input, shape index: {}]   ;;  %s2373_s5 = inlined_call_operand.hbm [shape: f32[2,256,128], index: 5, kind: output, shape index: {}]  }
   0x1   :  { %12 = vsyncpa [#allocation5 + $0x1], 0  ;;  %s1586_s18 = smov 0   ;;  %s1588_s19 = smov 0  }
   0x2   :  { %s1590_s20 = smov 0   ;;  %s1592_s21 = smov 0  }
   0x3   :  { %s1594_s22 = smov 0   ;;  %s1596_s23 = smov 0  }
   0x4   :  { %s1598_s24 = smov 0   ;;  %s1600_s25 = smov 0  }
   0x5 LB: > { %s1156_s26 = sadd.s32 4294967295, %s1552_s25   ;;  %s1157_s27 = sadd.s32 4294967294, %s1552_s25   ;;  %s1552_s25 = sphi %s1600_s25, %s18_s25   ;;  %s1548_s24 = sphi %s1598_s24, %s2454_s24   ;;  %s1544_s23 = sphi %s1596_s23, %s2453_s23   ;;  %s1540_s22 = sphi %s1594_s22, %s2452_s22   ;;  %s1536_s21 = sphi %s1592_s21, %s2451_s21   ;;  %s1532_s20 = sphi %s1590_s20, %s2450_s20   ;;  %s1528_s19 = sphi %s1588_s19, %s2449_s19   ;;  %s1524_s18 = sphi %s1586_s18, %s2448_s18  }
   0x6   : > { %s27_s28 = sadd.s32 1, %s1544_s23  ;;  %s30_s29 = sadd.s32 1, %s1548_s24 }
   0x7   : > { %p28_p0 = scmp.ge.s32.totalorder %s27_s28, 2  ;;  %p133_p1 = scmp.ne.s32.totalorder %s1532_s20, %s1528_s19 }
   0x8   : > { %p134_p2 = scmp.eq.s32.totalorder %s1156_s26, 3  ;;  %p139_p5 = scmp.ne.s32.totalorder %s1528_s19, %s1524_s18 }
   0x9   : > { %s2456_s28 = smov (%p28_p0, %s27_s28), 0  ;;  %s2458_s29 = smov (!%p28_p0, %s30_s29), %s1548_s24 }
   0xa   : > { %s119_s30 = ssub.s32 %s1544_s23, %s2456_s28  ;;  %p1637_p3 = por %p134_p2, %p133_p1 }
   0xb   : > { %p32_p4 = scmp.ge.s32.totalorder %s2458_s29, 2  ;;  %p140_p6 = scmp.eq.s32.totalorder %s1157_s27, 3 }
   0xc   : > { %p1159_p7 = scmp.ge.s32.totalorder %s1552_s25, 1  ;;  %p170_p9 = scmp.lt.s32.totalorder %s1552_s25, 5 }
   0xd   : > { %s2460_s29 = smov (%p32_p4, %s2458_s29), 0  ;;  %p1646_p8 = por %p140_p6, %p139_p5 }
   0xe   : > { %2406 = sst [smem:[#allocation10_spill]] %s2460_s29  ;;  %s118_s8 = ssub.s32 %s1548_s24, %s2460_s29 }
   0xf   : > { %s123_s9 = sadd.s32 1, %s1532_s20  ;;  %s120_s10 = sor.u32 %s119_s30, %s118_s8 }
  0x10   : > { %p171_p10 = pnand %p1159_p7, %p170_p9  ;;  %p121_p11 = scmp.eq.s32.totalorder %s120_s10, 0 }
  0x12   : > { %s1655_s11 = scalar_select %p121_p11, %s1532_s20, %s123_s9  }
  0x13   : > { %174 = sbr.rel (%p171_p10) target bundleno = 354 (0x162), region = 36 }
  0x18   : > { %s2374_s12 = sand.u32 1, %s1528_s19   ;;  %s1659_s13 = sand.u32 1, %s1536_s21 }
  0x19   : > { %s1160_s14 = sshll.u32 %s2374_s12, 7  ;;  %p1161_p12 = scmp.ne.s32.totalorder %s1536_s21, 0 }
  0x1a   : > { %s1663_s15 = scalar_lea.vmem [#allocation4], %s1160_s14  ;;  %s197_s16 = smul.u32 (!%p1161_p12), 432, %s1540_s22 }
  0x1b   : > { %196 = sbr.rel (%p1161_p12) target bundleno = 64 (0x40), region = 40 }
  0x1c   : > { %s1670_s27 = scalar_lea.vmem (!%p1161_p12), %s2368_s0, %s197_s16 }
  0x20   : > { %v211_v0 = vld [vmem:[%s1670_s27] sm:$0xff]  ;;  %v213_v1 = vld [vmem:[%s1670_s27 + $0x8] sm:$0xff]  ;;  %v215_v2 = vld [vmem:[%s1670_s27 + $0x18] sm:$0xff] }
  0x21   : > { %212 = vst [vmem:[#allocation2] sm:$0xff] %v211_v0  ;;  %v217_v3 = vld [vmem:[%s1670_s27 + $0x20] sm:$0xff]  ;;  %v219_v4 = vld [vmem:[%s1670_s27 + $0x30] sm:$0xff]  ;;  %v221_v5 = vld [vmem:[%s1670_s27 + $0x38] sm:$0xff] }
  0x22   : > { %214 = vst [vmem:[#allocation2 + $0x8] sm:$0xff] %v213_v1  ;;  %v223_v6 = vld [vmem:[%s1670_s27 + $0x48] sm:$0xff]  ;;  %v225_v7 = vld [vmem:[%s1670_s27 + $0x50] sm:$0xff]  ;;  %v227_v8 = vld [vmem:[%s1670_s27 + $0x60] sm:$0xff] }
  0x23   : > { %216 = vst [vmem:[#allocation2 + $0x18] sm:$0xff] %v215_v2  ;;  %v229_v9 = vld [vmem:[%s1670_s27 + $0x68] sm:$0xff]  ;;  %v231_v10 = vld [vmem:[%s1670_s27 + $0x78] sm:$0xff]  ;;  %v233_v11 = vld [vmem:[%s1670_s27 + $0x80] sm:$0xff] }
  0x24   : > { %218 = vst [vmem:[#allocation2 + $0x20] sm:$0xff] %v217_v3  ;;  %v235_v12 = vld [vmem:[%s1670_s27 + $0x90] sm:$0xff]  ;;  %v237_v13 = vld [vmem:[%s1670_s27 + $0x98] sm:$0xff]  ;;  %v239_v14 = vld [vmem:[%s1670_s27 + $0xa8] sm:$0xff] }
  0x25   : > { %220 = vst [vmem:[#allocation2 + $0x30] sm:$0xff] %v219_v4  ;;  %v241_v15 = vld [vmem:[%s1670_s27 + $0xb0] sm:$0xff]  ;;  %v243_v16 = vld [vmem:[%s1670_s27 + $0xc0] sm:$0xff]  ;;  %v245_v17 = vld [vmem:[%s1670_s27 + $0xc8] sm:$0xff] }
  0x26   : > { %222 = vst [vmem:[#allocation2 + $0x38] sm:$0xff] %v221_v5  ;;  %v247_v18 = vld [vmem:[%s1670_s27 + $0xd8] sm:$0xff]  ;;  %v249_v19 = vld [vmem:[%s1670_s27 + $0xe0] sm:$0xff]  ;;  %v1162_v20 = vld [vmem:[%s1670_s27 + $0x10] sm:$0x3] }
  0x27   : > { %224 = vst [vmem:[#allocation2 + $0x48] sm:$0xff] %v223_v6  ;;  %v1163_v21 = vld [vmem:[%s1670_s27 + $0x28] sm:$0x3]  ;;  %v1164_v22 = vld [vmem:[%s1670_s27 + $0x40] sm:$0x3] }
  0x28   : > { %226 = vst [vmem:[#allocation2 + $0x50] sm:$0xff] %v225_v7  ;;  %v1165_v23 = vld [vmem:[%s1670_s27 + $0x58] sm:$0x3]  ;;  %v1166_v24 = vld [vmem:[%s1670_s27 + $0x70] sm:$0x3] }
  0x29   : > { %228 = vst [vmem:[#allocation2 + $0x60] sm:$0xff] %v227_v8  ;;  %v1167_v25 = vld [vmem:[%s1670_s27 + $0x88] sm:$0x3]  ;;  %v1168_v26 = vld [vmem:[%s1670_s27 + $0xa0] sm:$0x3] }
  0x2a   : > { %230 = vst [vmem:[#allocation2 + $0x68] sm:$0xff] %v229_v9  ;;  %v1169_v27 = vld [vmem:[%s1670_s27 + $0xb8] sm:$0x3]  ;;  %v1170_v28 = vld [vmem:[%s1670_s27 + $0xd0] sm:$0x3] }
  0x2b   : > { %232 = vst [vmem:[#allocation2 + $0x78] sm:$0xff] %v231_v10  ;;  %v1171_v29 = vld [vmem:[%s1670_s27 + $0xe8] sm:$0x3] }
  0x2c   : > { %234 = vst [vmem:[#allocation2 + $0x80] sm:$0xff] %v233_v11 }
  0x2d   : > { %236 = vst [vmem:[#allocation2 + $0x90] sm:$0xff] %v235_v12 }
  0x2e   : > { %238 = vst [vmem:[#allocation2 + $0x98] sm:$0xff] %v237_v13 }
  0x2f   : > { %240 = vst [vmem:[#allocation2 + $0xa8] sm:$0xff] %v239_v14 }
  0x30   : > { %242 = vst [vmem:[#allocation2 + $0xb0] sm:$0xff] %v241_v15 }
  0x31   : > { %244 = vst [vmem:[#allocation2 + $0xc0] sm:$0xff] %v243_v16 }
  0x32   : > { %246 = vst [vmem:[#allocation2 + $0xc8] sm:$0xff] %v245_v17 }
  0x33   : > { %248 = vst [vmem:[#allocation2 + $0xd8] sm:$0xff] %v247_v18 }
  0x34   : > { %250 = vst [vmem:[#allocation2 + $0xe0] sm:$0xff] %v249_v19 }
  0x35   : > { %262 = vst [vmem:[#allocation2 + $0x10] sm:$0x3] %v1162_v20 }
  0x36   : > { %264 = vst [vmem:[#allocation2 + $0x28] sm:$0x3] %v1163_v21 }
  0x37   : > { %266 = vst [vmem:[#allocation2 + $0x40] sm:$0x3] %v1164_v22 }
  0x38   : > { %268 = vst [vmem:[#allocation2 + $0x58] sm:$0x3] %v1165_v23 }
  0x39   : > { %270 = vst [vmem:[#allocation2 + $0x70] sm:$0x3] %v1166_v24 }
  0x3a   : > { %272 = vst [vmem:[#allocation2 + $0x88] sm:$0x3] %v1167_v25 }
  0x3b   : > { %274 = vst [vmem:[#allocation2 + $0xa0] sm:$0x3] %v1168_v26 }
  0x3c   : > { %276 = vst [vmem:[#allocation2 + $0xb8] sm:$0x3] %v1169_v27 }
  0x3d   : > { %278 = vst [vmem:[#allocation2 + $0xd0] sm:$0x3] %v1170_v28 }
  0x3e   : > { %280 = vst [vmem:[#allocation2 + $0xe8] sm:$0x3] %v1171_v29 }
  0x3f   : > { %284 = vsyncadd [#allocation3], 2880 }
  0x40 PF: > { %s285_s30 = smul.u32 240, %s1659_s13  ;;  %s287_s9 = scalar_lea.sflag [#allocation3], %s1659_s13 }
  0x42   : > { %s1703_s8 = scalar_lea.vmem [#allocation2], %s285_s30 }
  0x43   : > { %1516 = dma.done.wait %s287_s9, 2880 }
  0x44   : > { %1517 = vsyncadd %s287_s9, 4294964416  ;;  %s292_s10 = sadd.s32 1, %s1536_s21 }
  0x45   : > { %p1172_p13 = scmp.ge.s32.totalorder %s292_s10, 2 }
  0x46   : > { %s297_s14 = ssub.s32 (!%p1172_p13), 1, %s1659_s13  ;;  %s1094_s16 = smul.u32 (!%p1172_p13), 192, %s1536_s21 }
  0x47   : > { %296 = sbr.rel (%p1172_p13) target bundleno = 108 (0x6c), region = 66  ;;  %s305_s12 = scalar_lea.sflag (!%p1172_p13), [#allocation3], %s297_s14 }
  0x48   : > { %s1095_s17 = smul.u32 (!%p1172_p13), 432, %s1540_s22 }
  0x49   : > { %s303_s26 = smul.u32 (!%p1172_p13), 240, %s297_s14 }
  0x4a   : > { %s1096_s27 = sadd.s32 (!%p1172_p13), %s1095_s17, %s1094_s16 }
  0x4b   : > { %s1715_s29 = scalar_lea.vmem (!%p1172_p13), %s2368_s0, %s1096_s27  ;;  %s1720_s9 = scalar_lea.vmem (!%p1172_p13), [#allocation2], %s303_s26 }
  0x4c   : > { %v1173_v30 = vld [vmem:[%s1715_s29 + $0xc0] sm:$0xff]  ;;  %v1174_v31 = vld [vmem:[%s1715_s29 + $0xc8] sm:$0xff]  ;;  %v1175_v32 = vld [vmem:[%s1715_s29 + $0xd8] sm:$0xff] }
  0x4d   : > { %319 = vst [vmem:[%s1720_s9] sm:$0xff] %v1173_v30  ;;  %v1176_v33 = vld [vmem:[%s1715_s29 + $0xe0] sm:$0xff]  ;;  %v1177_v34 = vld [vmem:[%s1715_s29 + $0xf0] sm:$0xff]  ;;  %v1178_v35 = vld [vmem:[%s1715_s29 + $0xf8] sm:$0xff] }
  0x4e   : > { %321 = vst [vmem:[%s1720_s9 + $0x8] sm:$0xff] %v1174_v31  ;;  %v1179_v36 = vld [vmem:[%s1715_s29 + $0x108] sm:$0xff]  ;;  %v1180_v37 = vld [vmem:[%s1715_s29 + $0x110] sm:$0xff]  ;;  %v1181_v38 = vld [vmem:[%s1715_s29 + $0x120] sm:$0xff] }
  0x4f   : > { %323 = vst [vmem:[%s1720_s9 + $0x18] sm:$0xff] %v1175_v32  ;;  %v1182_v39 = vld [vmem:[%s1715_s29 + $0x128] sm:$0xff]  ;;  %v1183_v40 = vld [vmem:[%s1715_s29 + $0x138] sm:$0xff]  ;;  %v1184_v41 = vld [vmem:[%s1715_s29 + $0x140] sm:$0xff] }
  0x50   : > { %325 = vst [vmem:[%s1720_s9 + $0x20] sm:$0xff] %v1176_v33  ;;  %v1185_v42 = vld [vmem:[%s1715_s29 + $0x150] sm:$0xff]  ;;  %v1186_v43 = vld [vmem:[%s1715_s29 + $0x158] sm:$0xff]  ;;  %v1187_v44 = vld [vmem:[%s1715_s29 + $0x168] sm:$0xff] }
  0x51   : > { %327 = vst [vmem:[%s1720_s9 + $0x30] sm:$0xff] %v1177_v34  ;;  %v1188_v45 = vld [vmem:[%s1715_s29 + $0x170] sm:$0xff]  ;;  %v1189_v46 = vld [vmem:[%s1715_s29 + $0x180] sm:$0xff]  ;;  %v1190_v47 = vld [vmem:[%s1715_s29 + $0x188] sm:$0xff] }
  0x52   : > { %329 = vst [vmem:[%s1720_s9 + $0x38] sm:$0xff] %v1178_v35  ;;  %v1191_v48 = vld [vmem:[%s1715_s29 + $0x198] sm:$0xff]  ;;  %v1192_v49 = vld [vmem:[%s1715_s29 + $0x1a0] sm:$0xff]  ;;  %v1193_v50 = vld [vmem:[%s1715_s29 + $0xd0] sm:$0x3] }
  0x53   : > { %331 = vst [vmem:[%s1720_s9 + $0x48] sm:$0xff] %v1179_v36  ;;  %v1195_v51 = vld [vmem:[%s1715_s29 + $0xe8] sm:$0x3]  ;;  %v1197_v52 = vld [vmem:[%s1715_s29 + $0x100] sm:$0x3] }
  0x54   : > { %333 = vst [vmem:[%s1720_s9 + $0x50] sm:$0xff] %v1180_v37  ;;  %v1199_v53 = vld [vmem:[%s1715_s29 + $0x118] sm:$0x3]  ;;  %v1201_v54 = vld [vmem:[%s1715_s29 + $0x130] sm:$0x3] }
  0x55   : > { %335 = vst [vmem:[%s1720_s9 + $0x60] sm:$0xff] %v1181_v38  ;;  %v1203_v55 = vld [vmem:[%s1715_s29 + $0x148] sm:$0x3]  ;;  %v1205_v56 = vld [vmem:[%s1715_s29 + $0x160] sm:$0x3] }
  0x56   : > { %337 = vst [vmem:[%s1720_s9 + $0x68] sm:$0xff] %v1182_v39  ;;  %v1207_v57 = vld [vmem:[%s1715_s29 + $0x178] sm:$0x3]  ;;  %v1209_v58 = vld [vmem:[%s1715_s29 + $0x190] sm:$0x3] }
  0x57   : > { %339 = vst [vmem:[%s1720_s9 + $0x78] sm:$0xff] %v1183_v40  ;;  %v1211_v59 = vld [vmem:[%s1715_s29 + $0x1a8] sm:$0x3] }
  0x58   : > { %341 = vst [vmem:[%s1720_s9 + $0x80] sm:$0xff] %v1184_v41 }
  0x59   : > { %343 = vst [vmem:[%s1720_s9 + $0x90] sm:$0xff] %v1185_v42 }
  0x5a   : > { %345 = vst [vmem:[%s1720_s9 + $0x98] sm:$0xff] %v1186_v43 }
  0x5b   : > { %347 = vst [vmem:[%s1720_s9 + $0xa8] sm:$0xff] %v1187_v44 }
  0x5c   : > { %349 = vst [vmem:[%s1720_s9 + $0xb0] sm:$0xff] %v1188_v45 }
  0x5d   : > { %351 = vst [vmem:[%s1720_s9 + $0xc0] sm:$0xff] %v1189_v46 }
  0x5e   : > { %353 = vst [vmem:[%s1720_s9 + $0xc8] sm:$0xff] %v1190_v47 }
  0x5f   : > { %355 = vst [vmem:[%s1720_s9 + $0xd8] sm:$0xff] %v1191_v48 }
  0x60   : > { %357 = vst [vmem:[%s1720_s9 + $0xe0] sm:$0xff] %v1192_v49 }
  0x61   : > { %1194 = vst [vmem:[%s1720_s9 + $0x10] sm:$0x3] %v1193_v50 }
  0x62   : > { %1196 = vst [vmem:[%s1720_s9 + $0x28] sm:$0x3] %v1195_v51 }
  0x63   : > { %1198 = vst [vmem:[%s1720_s9 + $0x40] sm:$0x3] %v1197_v52 }
  0x64   : > { %1200 = vst [vmem:[%s1720_s9 + $0x58] sm:$0x3] %v1199_v53 }
  0x65   : > { %1202 = vst [vmem:[%s1720_s9 + $0x70] sm:$0x3] %v1201_v54 }
  0x66   : > { %1204 = vst [vmem:[%s1720_s9 + $0x88] sm:$0x3] %v1203_v55 }
  0x67   : > { %1206 = vst [vmem:[%s1720_s9 + $0xa0] sm:$0x3] %v1205_v56 }
  0x68   : > { %1208 = vst [vmem:[%s1720_s9 + $0xb8] sm:$0x3] %v1207_v57 }
  0x69   : > { %1210 = vst [vmem:[%s1720_s9 + $0xd0] sm:$0x3] %v1209_v58 }
  0x6a   : > { %1212 = vst [vmem:[%s1720_s9 + $0xe8] sm:$0x3] %v1211_v59 }
  0x6b   : > { %391 = vsyncadd %s305_s12, 2880 }
  0x6c PF: > { %v1356_v60 = vld [vmem:[%s2371_s3 + $0x38] sm:$0xff]  ;;  %v1355_v61 = vld [vmem:[%s2371_s3 + $0x30] sm:$0xff]  ;;  %v392_v62 = vld [vmem:[%s2369_s1] sm:$0x7]  ;;  %s1342_s26 = sshll.u32 %s1536_s21, 4  ;;  %s1343_s29 = sshll.u32 %s1540_s22, 5 }
  0x6d   : > { %950 = vmatpush.bf16.msra.mxu0 %v1356_v60  ;;  %1357 = vmatpush.bf16.msra.mxu1 %v1356_v60  ;;  %v393_v63 = vld [vmem:[%s2369_s1 + $0x4] sm:$0x7]  ;;  %v394_v0 = vld [vmem:[%s2369_s1 + $0x8] sm:$0x7]  ;;  %v1797_v2 = vperm.slane %v392_v62, 0  ;;  %v1805_v7 = vperm.slane %v392_v62, 1  ;;  %s1043_s27 = sadd.s32 %s1343_s29, %s1342_s26 }
  0x6e   : > { %1358 = vmatpush.bf16.msra.mxu2 %v1356_v60  ;;  %1359 = vmatpush.bf16.msra.mxu3 %v1356_v60  ;;  %v1354_v3 = vld [vmem:[%s2371_s3 + $0x28] sm:$0xff]  ;;  %v1807_v8 = vperm.slane %v392_v62, 2  ;;  %v1809_v9 = vperm.slane %v393_v63, 0  ;;  %v1818_v15 = vperm.slane %v393_v63, 1  ;;  %v1820_v16 = vperm.slane %v393_v63, 2  ;;  %v1353_v36 = vld [vmem:[%s2371_s3 + $0x20] sm:$0xff] }
  0x6f   : > { %v1834_v23 = vperm.slane %v394_v0, 0  ;;  %v1847_v29 = vperm.slane %v394_v0, 1  ;;  %v1884_v48 = vperm.slane %v394_v0, 2  ;;  %v1352_v0 = vld [vmem:[%s2371_s3 + $0x18] sm:$0xff]  ;;  %s1344_s13 = sshll.u32 %s1043_s27, 3  ;;  %s1046_s21 = sshll.u32 %s1663_s15, 4  ;;  %s1047_s21 = int_to_ptr.vmem [resolvable:$true] %s1046_s21 }
  0x70   : > { %s1045_s9 = scalar_lea.hbm %s2373_s5, %s1344_s13  ;;  %s2446_s12 = sand.u32 1, %s1528_s19  }
  0x71   : > { %v395_v1 = vld [vmem:[%s1703_s8] sm:$0xff]  ;;  %v396_v4 = vld [vmem:[%s1703_s8 + $0x8] sm:$0xff]  ;;  %v1816_v14 = vld [vmem:[%s1703_s8 + $0x18] sm:$0xff]  ;;  %951 = vmatpush.bf16.msra.mxu0 %v1355_v61  ;;  %1360 = vmatpush.bf16.msra.mxu1 %v1355_v61  ;;  %s1048_s22 = sshll.u32 %s1045_s9, 4  ;;  %s1032_s10 = scalar_lea.sflag [#allocation5], %s2446_s12  ;;  %s1049_s22 = int_to_ptr.hbm [resolvable:$true] %s1048_s22 }
  0x72   : > { %v444_v5 = vld [vmem:[%s1703_s8 + $0x1] sm:$0xff]  ;;  %v445_v6 = vld [vmem:[%s1703_s8 + $0x9] sm:$0xff]  ;;  %v412_v10 = vmul.f32 %v1797_v2, %v395_v1  ;;  %v413_v11 = vmul.f32 %v1797_v2, %v396_v4  ;;  %v1829_v21 = vld [vmem:[%s1703_s8 + $0x19] sm:$0xff]  ;;  %1361 = vmatpush.bf16.msra.mxu2 %v1355_v61  ;;  %1362 = vmatpush.bf16.msra.mxu3 %v1355_v61  ;;  %v560_v25 = vmul.f32 %v1816_v14, %v1809_v9  ;;  %s1470_s16 = sshra.s32 %s1049_s22, 4  ;;  %s1476_s29 = scalar_lea.hbm %s2373_s5, 512  ;;  %s1471_s16 = int_to_ptr.hbm [resolvable:$true] %s1470_s16 }
  0x73   : > { %v493_v12 = vld [vmem:[%s1703_s8 + $0x2] sm:$0xff]  ;;  %v494_v13 = vld [vmem:[%s1703_s8 + $0xa] sm:$0xff]  ;;  %v461_v17 = vmul.f32 %v1805_v7, %v444_v5  ;;  %v462_v18 = vmul.f32 %v1805_v7, %v445_v6  ;;  %v1842_v27 = vld [vmem:[%s1703_s8 + $0x1a] sm:$0xff]  ;;  %v609_v32 = vmul.f32 %v1829_v21, %v1818_v15  ;;  %p1477_p4 = scmp.lt.s32.totalorder %s1471_s16, %s2373_s5 }
  0x74   : > { %v510_v19 = vmul.f32 %v1807_v8, %v493_v12  ;;  %v1826_v20 = vld [vmem:[%s1703_s8 + $0x20] sm:$0xff]  ;;  %v511_v24 = vmul.f32 %v1807_v8, %v494_v13  ;;  %v1854_v34 = vld [vmem:[%s1703_s8 + $0x30] sm:$0xff]  ;;  %v1857_v35 = vld [vmem:[%s1703_s8 + $0x38] sm:$0xff]  ;;  %v658_v37 = vmul.f32 %v1842_v27, %v1820_v16 }
  0x75   : > { %v1832_v22 = vld [vmem:[%s1703_s8 + $0x21] sm:$0xff]  ;;  %v561_v26 = vmul.f32 %v1826_v20, %v1809_v9  ;;  %v477_v30 = vadd.f32 %v461_v17, %v412_v10  ;;  %v478_v31 = vadd.f32 %v462_v18, %v413_v11  ;;  %v708_v39 = vmul.f32 %v1854_v34, %v1834_v23  ;;  %v1871_v41 = vld [vmem:[%s1703_s8 + $0x31] sm:$0xff]  ;;  %952 = vmatpush.bf16.msra.mxu0 %v1354_v3  ;;  %v1874_v44 = vld [vmem:[%s1703_s8 + $0x39] sm:$0xff] }
  0x76   : > { %v1845_v28 = vld [vmem:[%s1703_s8 + $0x22] sm:$0xff]  ;;  %v610_v33 = vmul.f32 %v1832_v22, %v1818_v15  ;;  %v709_v40 = vmul.f32 %v1857_v35, %v1834_v23  ;;  %1363 = vmatpush.bf16.msra.mxu1 %v1354_v3  ;;  %v757_v45 = vmul.f32 %v1871_v41, %v1847_v29  ;;  %v1879_v46 = vld [vmem:[%s1703_s8 + $0x32] sm:$0xff]  ;;  %v1882_v47 = vld [vmem:[%s1703_s8 + $0x3a] sm:$0xff]  ;;  %1364 = vmatpush.bf16.msra.mxu2 %v1354_v3 }
  0x77   : > { %v659_v38 = vmul.f32 %v1845_v28, %v1820_v16  ;;  %v526_v42 = vadd.f32 %v510_v19, %v477_v30  ;;  %v527_v43 = vadd.f32 %v511_v24, %v478_v31  ;;  %1365 = vmatpush.bf16.msra.mxu3 %v1354_v3  ;;  %v758_v49 = vmul.f32 %v1874_v44, %v1847_v29  ;;  %v1893_v52 = vld [vmem:[%s1703_s8 + $0x48] sm:$0xff]  ;;  %v1900_v57 = vld [vmem:[%s1703_s8 + $0x50] sm:$0xff]  ;;  %v1938_v31 = vld [vmem:[%s1703_s8 + $0x60] sm:$0xff] }
  0x78   : > { %v416_v50 = vmul.f32 %v1854_v34, %v1797_v2  ;;  %v417_v51 = vmul.f32 %v1857_v35, %v1797_v2  ;;  %v806_v55 = vmul.f32 %v1879_v46, %v1884_v48  ;;  %v807_v56 = vmul.f32 %v1882_v47, %v1884_v48  ;;  %v1911_v62 = vld [vmem:[%s1703_s8 + $0x49] sm:$0xff]  ;;  %v1914_v63 = vld [vmem:[%s1703_s8 + $0x51] sm:$0xff] }
  0x79   : > { %v576_v53 = vadd.f32 %v560_v25, %v526_v42  ;;  %v577_v54 = vadd.f32 %v561_v26, %v527_v43  ;;  %v465_v58 = vmul.f32 %v1871_v41, %v1805_v7  ;;  %v466_v59 = vmul.f32 %v1874_v44, %v1805_v7  ;;  %953 = vmatpush.bf16.msra.mxu0 %v1353_v36  ;;  %v1922_v5 = vld [vmem:[%s1703_s8 + $0x4a] sm:$0xff]  ;;  %v1925_v6 = vld [vmem:[%s1703_s8 + $0x52] sm:$0xff] }
  0x7a   : > { %v514_v60 = vmul.f32 %v1879_v46, %v1807_v8  ;;  %v515_v61 = vmul.f32 %v1882_v47, %v1807_v8  ;;  %1366 = vmatpush.bf16.msra.mxu1 %v1353_v36  ;;  %v564_v4 = vmul.f32 %v1893_v52, %v1809_v9  ;;  %1367 = vmatpush.bf16.msra.mxu2 %v1353_v36 }
  0x7b   : > { %v625_v1 = vadd.f32 %v609_v32, %v576_v53  ;;  %v626_v3 = vadd.f32 %v610_v33, %v577_v54  ;;  %1368 = vmatpush.bf16.msra.mxu3 %v1353_v36  ;;  %v481_v10 = vadd.f32 %v465_v58, %v416_v50  ;;  %v482_v11 = vadd.f32 %v466_v59, %v417_v51  ;;  %v1351_v32 = vld [vmem:[%s2371_s3 + $0x10] sm:$0xff] }
  0x7c   : > { %v565_v12 = vmul.f32 %v1900_v57, %v1809_v9  ;;  %v613_v18 = vmul.f32 %v1911_v62, %v1818_v15  ;;  %v614_v19 = vmul.f32 %v1914_v63, %v1818_v15  ;;  %v662_v26 = vmul.f32 %v1922_v5, %v1820_v16  ;;  %v1951_v51 = vld [vmem:[%s1703_s8 + $0x61] sm:$0xff]  ;;  %v1954_v53 = vld [vmem:[%s1703_s8 + $0x69] sm:$0xff] }
  0x7d   : > { %v674_v13 = vadd.f32 %v658_v37, %v625_v1  ;;  %v675_v17 = vadd.f32 %v659_v38, %v626_v3  ;;  %v530_v24 = vadd.f32 %v514_v60, %v481_v10  ;;  %v531_v25 = vadd.f32 %v515_v61, %v482_v11  ;;  %954 = vmatpush.bf16.msra.mxu0 %v1352_v0  ;;  %v1944_v37 = vld [vmem:[%s1703_s8 + $0x68] sm:$0xff] }
  0x7e   : > { %v663_v30 = vmul.f32 %v1925_v6, %v1820_v16  ;;  %1369 = vmatpush.bf16.msra.mxu1 %v1352_v0  ;;  %v712_v38 = vmul.f32 %v1938_v31, %v1834_v23  ;;  %1370 = vmatpush.bf16.msra.mxu2 %v1352_v0  ;;  %v713_v50 = vmul.f32 %v1944_v37, %v1834_v23  ;;  %v1966_v60 = vld [vmem:[%s1703_s8 + $0x62] sm:$0xff]  ;;  %v1969_v61 = vld [vmem:[%s1703_s8 + $0x6a] sm:$0xff] }
  0x7f   : > { %v724_v33 = vadd.f32 %v708_v39, %v674_v13  ;;  %v725_v36 = vadd.f32 %v709_v40, %v675_v17  ;;  %1371 = vmatpush.bf16.msra.mxu3 %v1352_v0  ;;  %v580_v42 = vadd.f32 %v564_v4, %v530_v24  ;;  %v581_v43 = vadd.f32 %v565_v12, %v531_v25  ;;  %v1959_v40 = vld [vmem:[%s2370_s2] ss:$0 sm:$0xff]  ;;  %v1350_v3 = vld [vmem:[%s2371_s3 + $0x8] sm:$0xff] }
  0x80   : > { %v761_v58 = vmul.f32 %v1951_v51, %v1847_v29  ;;  %v762_v59 = vmul.f32 %v1954_v53, %v1847_v29  ;;  %v420_v11 = vmul.f32 %v1938_v31, %v1797_v2  ;;  %v421_v17 = vmul.f32 %v1944_v37, %v1797_v2  ;;  %v1989_v24 = vld [vmem:[%s1703_s8 + $0x78] sm:$0xff] }
  0x81   : > { %v773_v39 = vadd.f32 %v757_v45, %v724_v33  ;;  %v774_v54 = vadd.f32 %v758_v49, %v725_v36  ;;  %v629_v0 = vadd.f32 %v613_v18, %v580_v42  ;;  %v630_v1 = vadd.f32 %v614_v19, %v581_v43  ;;  %955 = vmatpush.bf16.msra.mxu0 %v1351_v32  ;;  %v1996_v33 = vld [vmem:[%s1703_s8 + $0x80] sm:$0xff] }
  0x82   : > { %v810_v45 = vmul.f32 %v1966_v60, %v1884_v48  ;;  %v811_v49 = vmul.f32 %v1969_v61, %v1884_v48  ;;  %1372 = vmatpush.bf16.msra.mxu1 %v1351_v32  ;;  %1373 = vmatpush.bf16.msra.mxu2 %v1351_v32  ;;  %v1349_v36 = vld [vmem:[%s2371_s3] sm:$0xff] }
  0x83   : > { %v822_v4 = vadd.f32 %v806_v55, %v773_v39  ;;  %v823_v10 = vadd.f32 %v807_v56, %v774_v54  ;;  %1374 = vmatpush.bf16.msra.mxu3 %v1351_v32  ;;  %v678_v12 = vadd.f32 %v662_v26, %v629_v0  ;;  %v679_v13 = vadd.f32 %v663_v30, %v630_v1  ;;  %v2002_v39 = vld [vmem:[%s1703_s8 + $0x79] sm:$0xff]  ;;  %v2005_v54 = vld [vmem:[%s1703_s8 + $0x81] sm:$0xff] }
  0x84   : > { %v469_v55 = vmul.f32 %v1951_v51, %v1805_v7  ;;  %v470_v56 = vmul.f32 %v1954_v53, %v1805_v7  ;;  %v518_v30 = vmul.f32 %v1966_v60, %v1807_v8  ;;  %v519_v32 = vmul.f32 %v1969_v61, %v1807_v8  ;;  %2408 = vst [vmem:[#allocation11_spill] sm:$0xff] %v2002_v39 }
  0x85   : > { %v842_v18 = vadd.f32 %v1959_v40, %v822_v4  ;;  %v843_v19 = vadd.f32 %v1959_v40, %v823_v10  ;;  %v728_v25 = vadd.f32 %v712_v38, %v678_v12  ;;  %v729_v26 = vadd.f32 %v713_v50, %v679_v13  ;;  %956 = vmatpush.bf16.msra.mxu0 %v1350_v3  ;;  %v2010_v10 = vld [vmem:[%s1703_s8 + $0x7a] sm:$0xff] }
  0x86   : > { %1375 = vmatpush.bf16.msra.mxu1 %v1350_v3  ;;  %v485_v38 = vadd.f32 %v469_v55, %v420_v11  ;;  %v486_v50 = vadd.f32 %v470_v56, %v421_v17  ;;  %2409 = vst [vmem:[#allocation12_spill] sm:$0xff] %v2005_v54  ;;  %1376 = vmatpush.bf16.msra.mxu2 %v1350_v3  ;;  %v2015_v17 = vld [vmem:[%s1703_s8 + $0x82] sm:$0xff] }
  0x87   : > { %v858_v42 = vmax.f32 %v842_v18, 0.0  ;;  %v859_v43 = vmax.f32 %v843_v19, 0.0  ;;  %1377 = vmatpush.bf16.msra.mxu3 %v1350_v3  ;;  %v777_v0 = vadd.f32 %v761_v58, %v728_v25  ;;  %v778_v1 = vadd.f32 %v762_v59, %v729_v26  ;;  %2410 = vst [vmem:[#allocation13_spill] sm:$0xff] %v2010_v10 }
  0x88   : > { %v568_v4 = vmul.f32 %v1989_v24, %v1809_v9  ;;  %v534_v13 = vadd.f32 %v518_v30, %v485_v38  ;;  %v535_v18 = vadd.f32 %v519_v32, %v486_v50  ;;  %v569_v11 = vmul.f32 %v1996_v33, %v1809_v9  ;;  %2411 = vst [vmem:[#allocation14_spill] sm:$0xff] %v2015_v17  ;;  %v2028_v30 = vld [vmem:[%s1703_s8 + $0x90] sm:$0xff]  ;;  %v2031_v32 = vld [vmem:[%s1703_s8 + $0x98] sm:$0xff] }
  0x89   : > { %v874_v12 = vpack.c.bf16 %v859_v43, %v858_v42  ;;  %v826_v19 = vadd.f32 %v810_v45, %v777_v0  ;;  %v827_v55 = vadd.f32 %v811_v49, %v778_v1  ;;  %v617_v58 = vmul.f32 %v2002_v39, %v1818_v15  ;;  %957 = vmatpush.bf16.msra.mxu0 %v1349_v36  ;;  %v2038_v50 = vld [vmem:[%s1703_s8 + $0x91] sm:$0xff]  ;;  %v2041_v0 = vld [vmem:[%s1703_s8 + $0x99] sm:$0xff] }
  0x8a   : > { %v618_v59 = vmul.f32 %v2005_v54, %v1818_v15  ;;  %1378 = vmatpush.bf16.msra.mxu1 %v1349_v36  ;;  %v584_v3 = vadd.f32 %v568_v4, %v534_v13  ;;  %v585_v56 = vadd.f32 %v569_v11, %v535_v18  ;;  %v666_v25 = vmul.f32 %v2010_v10, %v1820_v16  ;;  %v2048_v11 = vld [vmem:[%s1703_s8 + $0x92] sm:$0xff] }
  0x8b   : > { %1379 = vmatpush.bf16.msra.mxu2 %v1349_v36  ;;  %1380 = vmatpush.bf16.msra.mxu3 %v1349_v36  ;;  %v846_v45 = vadd.f32 %v1959_v40, %v826_v19  ;;  %v847_v49 = vadd.f32 %v1959_v40, %v827_v55  ;;  %v667_v26 = vmul.f32 %v2015_v17, %v1820_v16  ;;  %v2051_v19 = vld [vmem:[%s1703_s8 + $0x9a] sm:$0xff] }
  0x8c   : > { %2412 = vst [vmem:[#allocation15_spill] sm:$0xff] %v2028_v30  ;;  %v633_v42 = vadd.f32 %v617_v58, %v584_v3  ;;  %v634_v43 = vadd.f32 %v618_v59, %v585_v56  ;;  %v716_v38 = vmul.f32 %v2028_v30, %v1834_v23  ;;  %v717_v36 = vmul.f32 %v2031_v32, %v1834_v23  ;;  %v2058_v3 = vld [vmem:[%s1703_s8 + $0xa8] sm:$0xff]  ;;  %v2061_v56 = vld [vmem:[%s1703_s8 + $0xb0] sm:$0xff] }
  0x8d   : > { %2413 = vst [vmem:[#allocation16_spill] sm:$0xff] %v2031_v32  ;;  %958 = vmatmul.bf16.vlgmr.msra.gmra.mxu0 %v874_v12  ;;  %v862_v1 = vmax.f32 %v846_v45, 0.0  ;;  %v863_v4 = vmax.f32 %v847_v49, 0.0  ;;  %v765_v13 = vmul.f32 %v2038_v50, %v1847_v29  ;;  %v766_v18 = vmul.f32 %v2041_v0, %v1847_v29 }
  0x8e   : > { %2414 = vst [vmem:[#allocation17_spill] sm:$0xff] %v2038_v50  ;;  %v682_v55 = vadd.f32 %v666_v25, %v633_v42  ;;  %v683_v58 = vadd.f32 %v667_v26, %v634_v43  ;;  %v814_v12 = vmul.f32 %v2048_v11, %v1884_v48  ;;  %v815_v59 = vmul.f32 %v2051_v19, %v1884_v48  ;;  %v2070_v42 = vld [vmem:[%s1703_s8 + $0xa9] sm:$0xff] }
  0x8f   : > { %2415 = vst [vmem:[#allocation18_spill] sm:$0xff] %v2041_v0  ;;  %v876_v45 = vpack.c.bf16 %v863_v4, %v862_v1  ;;  %v424_v49 = vmul.f32 %v2028_v30, %v1797_v2  ;;  %v425_v25 = vmul.f32 %v2031_v32, %v1797_v2  ;;  %v473_v26 = vmul.f32 %v2038_v50, %v1805_v7  ;;  %v2077_v4 = vld [vmem:[%s1703_s8 + $0xb1] sm:$0xff] }
  0x90   : > { %2416 = vst [vmem:[#allocation19_spill] sm:$0xff] %v2048_v11  ;;  %v732_v43 = vadd.f32 %v716_v38, %v682_v55  ;;  %v733_v17 = vadd.f32 %v717_v36, %v683_v58  ;;  %v474_v10 = vmul.f32 %v2041_v0, %v1805_v7  ;;  %v522_v1 = vmul.f32 %v2048_v11, %v1807_v8  ;;  %v2080_v30 = vld [vmem:[%s1703_s8 + $0xaa] sm:$0xff]  ;;  %v2083_v32 = vld [vmem:[%s1703_s8 + $0xb2] sm:$0xff]  ;;  %v2092_v58 = vld [vmem:[%s1703_s8 + $0xc0] sm:$0xff] }
  0x91   : > { %2417 = vst [vmem:[#allocation20_spill] sm:$0xff] %v2051_v19  ;;  %968 = vmatmul.bf16.vlgmr.msra.gmra.mxu1 %v876_v45  ;;  %v489_v50 = vadd.f32 %v473_v26, %v424_v49  ;;  %v523_v38 = vmul.f32 %v2051_v19, %v1807_v8  ;;  %v572_v36 = vmul.f32 %v2058_v3, %v1809_v9  ;;  %v2097_v49 = vld [vmem:[%s1703_s8 + $0xc8] sm:$0xff] }
  0x92   : > { %2418 = vst [vmem:[#allocation21_spill] sm:$0xff] %v2058_v3  ;;  %v573_v55 = vmul.f32 %v2061_v56, %v1809_v9  ;;  %v781_v11 = vadd.f32 %v765_v13, %v732_v43  ;;  %v782_v0 = vadd.f32 %v766_v18, %v733_v17  ;;  %v490_v54 = vadd.f32 %v474_v10, %v425_v25  ;;  %v2100_v26 = vld [vmem:[%s1703_s8 + $0xc1] sm:$0xff]  ;;  %v2103_v19 = vld [vmem:[%s1703_s8 + $0xc9] sm:$0xff] }
  0x93   : > { %2419 = vst [vmem:[#allocation22_spill] sm:$0xff] %v2061_v56  ;;  %v621_v45 = vmul.f32 %v2070_v42, %v1818_v15  ;;  %v538_v39 = vadd.f32 %v522_v1, %v489_v50  ;;  %v622_v3 = vmul.f32 %v2077_v4, %v1818_v15  ;;  %v670_v56 = vmul.f32 %v2080_v30, %v1820_v16  ;;  %v2112_v10 = vld [vmem:[%s1703_s8 + $0xc2] sm:$0xff] }
  0x94   : > { %2420 = vst [vmem:[#allocation23_spill] sm:$0xff] %v2070_v42  ;;  %v671_v17 = vmul.f32 %v2083_v32, %v1820_v16  ;;  %v830_v13 = vadd.f32 %v814_v12, %v781_v11  ;;  %v831_v18 = vadd.f32 %v815_v59, %v782_v0  ;;  %v539_v25 = vadd.f32 %v523_v38, %v490_v54  ;;  %v2117_v42 = vld [vmem:[%s1703_s8 + $0xca] sm:$0xff] }
  0x95   : > { %2421 = vst [vmem:[#allocation24_spill] sm:$0xff] %v2077_v4  ;;  %v720_v43 = vmul.f32 %v2092_v58, %v1834_v23  ;;  %v588_v50 = vadd.f32 %v572_v36, %v538_v39  ;;  %v721_v1 = vmul.f32 %v2097_v49, %v1834_v23  ;;  %v818_v11 = vmul.f32 %v2112_v10, %v1884_v48 }
  0x96   : > { %2422 = vst [vmem:[#allocation25_spill] sm:$0xff] %v2080_v30  ;;  %v769_v30 = vmul.f32 %v2100_v26, %v1847_v29  ;;  %v850_v4 = vadd.f32 %v1959_v40, %v830_v13  ;;  %v851_v0 = vadd.f32 %v1959_v40, %v831_v18  ;;  %v589_v54 = vadd.f32 %v573_v55, %v539_v25 }
  0x97   : > { %2423 = vst [vmem:[#allocation26_spill] sm:$0xff] %v2083_v32  ;;  %v770_v32 = vmul.f32 %v2103_v19, %v1847_v29  ;;  %v637_v12 = vadd.f32 %v621_v45, %v588_v50  ;;  %v819_v39 = vmul.f32 %v2117_v42, %v1884_v48  ;;  %v414_v59 = vmul.f32 %v1816_v14, %v1797_v2 }
  0x98   : > { %2424 = vst [vmem:[#allocation27_spill] sm:$0xff] %v2100_v26  ;;  %v415_v38 = vmul.f32 %v1826_v20, %v1797_v2  ;;  %v866_v36 = vmax.f32 %v850_v4, 0.0  ;;  %v638_v26 = vadd.f32 %v622_v3, %v589_v54  ;;  %v463_v13 = vmul.f32 %v1829_v21, %v1805_v7 }
  0x99   : > { %2425 = vst [vmem:[#allocation28_spill] sm:$0xff] %v2103_v19  ;;  %v867_v19 = vmax.f32 %v851_v0, 0.0  ;;  %v686_v55 = vadd.f32 %v670_v56, %v637_v12  ;;  %v464_v18 = vmul.f32 %v1832_v22, %v1805_v7  ;;  %v512_v45 = vmul.f32 %v1842_v27, %v1807_v8 }
  0x9a   : > { %2426 = vst [vmem:[#allocation29_spill] sm:$0xff] %v2117_v42  ;;  %v513_v25 = vmul.f32 %v1845_v28, %v1807_v8  ;;  %v687_v50 = vadd.f32 %v671_v17, %v638_v26  ;;  %v479_v42 = vadd.f32 %v463_v13, %v414_v59  ;;  %v562_v20 = vmul.f32 %v1854_v34, %v1809_v9 }
  0x9b   : > { %v878_v14 = vpack.c.bf16 %v867_v19, %v866_v36  ;;  %v736_v3 = vadd.f32 %v720_v43, %v686_v55  ;;  %v480_v4 = vadd.f32 %v464_v18, %v415_v38  ;;  %v563_v21 = vmul.f32 %v1857_v35, %v1809_v9 }
  0x9c   : > { %v611_v22 = vmul.f32 %v1871_v41, %v1818_v15  ;;  %v737_v56 = vadd.f32 %v721_v1, %v687_v50  ;;  %v528_v27 = vadd.f32 %v512_v45, %v479_v42  ;;  %v612_v28 = vmul.f32 %v1874_v44, %v1818_v15 }
  0x9d   : > { %978 = vmatmul.bf16.vlgmr.msra.gmra.mxu2 %v878_v14  ;;  %v660_v19 = vmul.f32 %v1879_v46, %v1820_v16  ;;  %v785_v26 = vadd.f32 %v769_v30, %v736_v3  ;;  %v529_v17 = vadd.f32 %v513_v25, %v480_v4  ;;  %v661_v34 = vmul.f32 %v1882_v47, %v1820_v16 }
  0x9e   : > { %v710_v35 = vmul.f32 %v1893_v52, %v1834_v23  ;;  %v786_v43 = vadd.f32 %v770_v32, %v737_v56  ;;  %v578_v0 = vadd.f32 %v562_v20, %v528_v27  ;;  %v711_v41 = vmul.f32 %v1900_v57, %v1834_v23 }
  0x9f   : > { %v759_v42 = vmul.f32 %v1911_v62, %v1847_v29  ;;  %v834_v44 = vadd.f32 %v818_v11, %v785_v26  ;;  %v579_v1 = vadd.f32 %v563_v21, %v529_v17  ;;  %v760_v46 = vmul.f32 %v1914_v63, %v1847_v29 }
  0xa0   : > { %v808_v30 = vmul.f32 %v1922_v5, %v1884_v48  ;;  %v835_v47 = vadd.f32 %v819_v39, %v786_v43  ;;  %v627_v54 = vadd.f32 %v611_v22, %v578_v0  ;;  %v809_v32 = vmul.f32 %v1925_v6, %v1884_v48  ;;  %v2428_v0 = vld [vmem:[#allocation12_spill] sm:$0xff] }
  0xa1   : > { %v418_v12 = vmul.f32 %v1893_v52, %v1797_v2  ;;  %v854_v59 = vadd.f32 %v1959_v40, %v834_v44  ;;  %v628_v38 = vadd.f32 %v612_v28, %v579_v1  ;;  %v419_v11 = vmul.f32 %v1900_v57, %v1797_v2  ;;  %v2430_v1 = vld [vmem:[#allocation14_spill] sm:$0xff] }
  0xa2   : > { %v467_v36 = vmul.f32 %v1911_v62, %v1805_v7  ;;  %v855_v13 = vadd.f32 %v1959_v40, %v835_v47  ;;  %v676_v55 = vadd.f32 %v660_v19, %v627_v54  ;;  %v468_v39 = vmul.f32 %v1914_v63, %v1805_v7 }
  0xa3   : > { %v516_v18 = vmul.f32 %v1922_v5, %v1807_v8  ;;  %v870_v45 = vmax.f32 %v854_v59, 0.0  ;;  %v677_v52 = vadd.f32 %v661_v34, %v628_v38  ;;  %v517_v14 = vmul.f32 %v1925_v6, %v1807_v8 }
  0xa4   : > { %v483_v25 = vadd.f32 %v467_v36, %v418_v12  ;;  %v871_v50 = vmax.f32 %v855_v13, 0.0  ;;  %v726_v57 = vadd.f32 %v710_v35, %v676_v55  ;;  %v484_v20 = vadd.f32 %v468_v39, %v419_v11 }
  0xa5   : > { %v566_v62 = vmul.f32 %v1938_v31, %v1809_v9  ;;  %v727_v3 = vadd.f32 %v711_v41, %v677_v52  ;;  %v567_v63 = vmul.f32 %v1944_v37, %v1809_v9  ;;  %v615_v5 = vmul.f32 %v1951_v51, %v1818_v15 }
  0xa6   : > { %v532_v4 = vadd.f32 %v516_v18, %v483_v25  ;;  %v880_v21 = vpack.c.bf16 %v871_v50, %v870_v45  ;;  %v775_v22 = vadd.f32 %v759_v42, %v726_v57  ;;  %v533_v56 = vadd.f32 %v517_v14, %v484_v20  ;;  %v2429_v42 = vld [vmem:[#allocation13_spill] sm:$0xff]  ;;  %v2432_v50 = vld [vmem:[#allocation16_spill] sm:$0xff] }
  0xa7   : > { %v616_v6 = vmul.f32 %v1954_v53, %v1818_v15  ;;  %v776_v27 = vadd.f32 %v760_v46, %v727_v3  ;;  %v664_v19 = vmul.f32 %v1966_v60, %v1820_v16  ;;  %v665_v31 = vmul.f32 %v1969_v61, %v1820_v16  ;;  %v2427_v53 = vld [vmem:[#allocation11_spill] sm:$0xff]  ;;  %v2433_v20 = vld [vmem:[#allocation17_spill] sm:$0xff] }
  0xa8   : > { %v582_v28 = vadd.f32 %v566_v62, %v532_v4  ;;  %988 = vmatmul.bf16.vlgmr.msra.gmra.mxu3 %v880_v21  ;;  %v824_v26 = vadd.f32 %v808_v30, %v775_v22  ;;  %v583_v37 = vadd.f32 %v567_v63, %v533_v56  ;;  %v714_v51 = vmul.f32 %v1989_v24, %v1834_v23  ;;  %v2435_v56 = vld [vmem:[#allocation19_spill] sm:$0xff] }
  0xa9   : > { %v715_v17 = vmul.f32 %v1996_v33, %v1834_v23  ;;  %v825_v34 = vadd.f32 %v809_v32, %v776_v27  ;;  %v763_v43 = vmul.f32 %v2427_v53, %v1847_v29  ;;  %v764_v60 = vmul.f32 %v2428_v0, %v1847_v29  ;;  %v2436_v27 = vld [vmem:[#allocation20_spill] sm:$0xff] }
  0xaa   : > { %v631_v35 = vadd.f32 %v615_v5, %v582_v28  ;;  %v844_v41 = vadd.f32 %v1959_v40, %v824_v26  ;;  %v632_v61 = vadd.f32 %v616_v6, %v583_v37  ;;  %v812_v44 = vmul.f32 %v2429_v42, %v1884_v48  ;;  %v2434_v5 = vld [vmem:[#allocation18_spill] sm:$0xff] }
  0xab   : > { %v813_v46 = vmul.f32 %v2430_v1, %v1884_v48  ;;  %v845_v30 = vadd.f32 %v1959_v40, %v825_v34  ;;  %v422_v54 = vmul.f32 %v1989_v24, %v1797_v2  ;;  %v423_v32 = vmul.f32 %v1996_v33, %v1797_v2  ;;  %v2431_v33 = vld [vmem:[#allocation15_spill] sm:$0xff] }
  0xac   : > { %v680_v47 = vadd.f32 %v664_v19, %v631_v35  ;;  %v860_v12 = vmax.f32 %v844_v41, 0.0  ;;  %v681_v59 = vadd.f32 %v665_v31, %v632_v61  ;;  %v471_v38 = vmul.f32 %v2427_v53, %v1805_v7  ;;  %v2437_v19 = vld [vmem:[#allocation21_spill] sm:$0xff]  ;;  %v2439_v53 = vld [vmem:[#allocation23_spill] sm:$0xff] }
  0xad   : > { %v472_v11 = vmul.f32 %v2428_v0, %v1805_v7  ;;  %v861_v36 = vmax.f32 %v845_v30, 0.0  ;;  %v520_v55 = vmul.f32 %v2429_v42, %v1807_v8  ;;  %v521_v39 = vmul.f32 %v2430_v1, %v1807_v8  ;;  %v2440_v0 = vld [vmem:[#allocation24_spill] sm:$0xff]  ;;  %v2441_v41 = vld [vmem:[#allocation25_spill] sm:$0xff] }
  0xae   : > { %v730_v13 = vadd.f32 %v714_v51, %v680_v47  ;;  %v731_v24 = vadd.f32 %v715_v17, %v681_v59  ;;  %v487_v18 = vadd.f32 %v471_v38, %v422_v54  ;;  %v570_v52 = vmul.f32 %v2431_v33, %v1809_v9  ;;  %v2438_v17 = vld [vmem:[#allocation22_spill] sm:$0xff] }
  0xaf   : > { %v488_v45 = vadd.f32 %v472_v11, %v423_v32  ;;  %v875_v25 = vpack.c.bf16 %v861_v36, %v860_v12  ;;  %v571_v57 = vmul.f32 %v2432_v50, %v1809_v9  ;;  %v619_v62 = vmul.f32 %v2433_v20, %v1818_v15 }
  0xb0   : > { %v779_v14 = vadd.f32 %v763_v43, %v730_v13  ;;  %v780_v3 = vadd.f32 %v764_v60, %v731_v24  ;;  %v536_v4 = vadd.f32 %v520_v55, %v487_v18  ;;  %v620_v21 = vmul.f32 %v2434_v5, %v1818_v15 }
  0xb1   : > { %v537_v63 = vadd.f32 %v521_v39, %v488_v45  ;;  %963 = vmatmul.bf16.gmra.mxu0 %v875_v25  ;;  %v668_v6 = vmul.f32 %v2435_v56, %v1820_v16  ;;  %v669_v28 = vmul.f32 %v2436_v27, %v1820_v16  ;;  %v718_v31 = vmul.f32 %v2437_v19, %v1834_v23  ;;  %v2443_v25 = vld [vmem:[#allocation27_spill] sm:$0xff] }
  0xb2   : > { %v828_v22 = vadd.f32 %v812_v44, %v779_v14  ;;  %v829_v26 = vadd.f32 %v813_v46, %v780_v3  ;;  %v586_v37 = vadd.f32 %v570_v52, %v536_v4  ;;  %v719_v34 = vmul.f32 %v2438_v17, %v1834_v23  ;;  %v2442_v46 = vld [vmem:[#allocation26_spill] sm:$0xff] }
  0xb3   : > { %v587_v51 = vadd.f32 %v571_v57, %v537_v63  ;;  %v767_v43 = vmul.f32 %v2439_v53, %v1847_v29  ;;  %v768_v60 = vmul.f32 %v2440_v0, %v1847_v29  ;;  %v816_v61 = vmul.f32 %v2441_v41, %v1884_v48  ;;  %v1276_v63 = vld [vmem:[%s1703_s8 + $0xe0] sm:$0xff] }
  0xb4   : > { %v848_v35 = vadd.f32 %v1959_v40, %v828_v22  ;;  %v849_v42 = vadd.f32 %v1959_v40, %v829_v26  ;;  %v635_v44 = vadd.f32 %v619_v62, %v586_v37  ;;  %v817_v30 = vmul.f32 %v2442_v46, %v1884_v48  ;;  %v1275_v62 = vld [vmem:[%s1703_s8 + $0xd8] sm:$0xff] }
  0xb5   : > { %v636_v1 = vadd.f32 %v620_v21, %v587_v51  ;;  %v426_v54 = vmul.f32 %v2437_v19, %v1797_v2  ;;  %v427_v32 = vmul.f32 %v2438_v17, %v1797_v2  ;;  %v475_v12 = vmul.f32 %v2439_v53, %v1805_v7  ;;  %v2445_v21 = vld [vmem:[#allocation29_spill] sm:$0xff] }
  0xb6   : > { %v864_v47 = vmax.f32 %v848_v35, 0.0  ;;  %v865_v59 = vmax.f32 %v849_v42, 0.0  ;;  %v684_v38 = vadd.f32 %v668_v6, %v635_v44  ;;  %v476_v36 = vmul.f32 %v2440_v0, %v1805_v7  ;;  %v1291_v56 = vld [vmem:[%s1703_s8 + $0xd9] sm:$0xff]  ;;  %v1308_v17 = vld [vmem:[%s1703_s8 + $0xe2] sm:$0xff] }
  0xb7   : > { %v685_v11 = vadd.f32 %v669_v28, %v636_v1  ;;  %v491_v13 = vadd.f32 %v475_v12, %v426_v54  ;;  %v524_v55 = vmul.f32 %v2441_v41, %v1807_v8  ;;  %v525_v39 = vmul.f32 %v2442_v46, %v1807_v8  ;;  %v1292_v28 = vld [vmem:[%s1703_s8 + $0xe1] sm:$0xff] }
  0xb8   : > { %v574_v2 = vmul.f32 %v2092_v58, %v1809_v9  ;;  %v877_v24 = vpack.c.bf16 %v865_v59, %v864_v47  ;;  %v734_v18 = vadd.f32 %v718_v31, %v684_v38  ;;  %v492_v33 = vadd.f32 %v476_v36, %v427_v32  ;;  %v2444_v58 = vld [vmem:[#allocation28_spill] sm:$0xff] }
  0xb9   : > { %v735_v45 = vadd.f32 %v719_v34, %v685_v11  ;;  %v540_v52 = vadd.f32 %v524_v55, %v491_v13  ;;  %v575_v7 = vmul.f32 %v2097_v49, %v1809_v9  ;;  %v623_v14 = vmul.f32 %v2443_v25, %v1818_v15  ;;  %v1307_v26 = vld [vmem:[%s1703_s8 + $0xda] sm:$0xff]  ;;  %s1472_s8 = scalar_lea.hbm %s1471_s16, 128 }
  0xba   : > { %973 = vmatmul.bf16.gmra.mxu1 %v877_v24  ;;  %v783_v50 = vadd.f32 %v767_v43, %v734_v18  ;;  %v541_v57 = vadd.f32 %v525_v39, %v492_v33  ;;  %v624_v20 = vmul.f32 %v2444_v58, %v1818_v15  ;;  %v672_v4 = vmul.f32 %v2112_v10, %v1820_v16  ;;  %p1473_p0 = scmp.ne.s32.totalorder %s1471_s16, %s1472_s8  ;;  %p1478_p5 = scmp.lt.s32.totalorder %s1476_s29, %s1472_s8 }
  0xbb   : > { %v784_v8 = vadd.f32 %v768_v60, %v735_v45  ;;  %v590_v3 = vadd.f32 %v574_v2, %v540_v52  ;;  %v673_v22 = vmul.f32 %v2445_v21, %v1820_v16  ;;  %v722_v27 = vmul.f32 %v1275_v62, %v1834_v23 }
  0xbc   : > { %v832_v9 = vadd.f32 %v816_v61, %v783_v50  ;;  %v591_v5 = vadd.f32 %v575_v7, %v541_v57  ;;  %v723_v10 = vmul.f32 %v1276_v63, %v1834_v23  ;;  %v771_v51 = vmul.f32 %v1291_v56, %v1847_v29  ;;  %p1474_p1 = pnand %p1473_p0, %p1637_p3  ;;  %p1479_p6 = por %p1478_p5, %p1477_p4 }
  0xbd   : > { %v833_v49 = vadd.f32 %v817_v30, %v784_v8  ;;  %v639_v6 = vadd.f32 %v623_v14, %v590_v3  ;;  %v772_v53 = vmul.f32 %v1292_v28, %v1847_v29  ;;  %v820_v0 = vmul.f32 %v1307_v26, %v1884_v48 }
  0xbe   : > { %v852_v15 = vadd.f32 %v1959_v40, %v832_v9  ;;  %v640_v31 = vadd.f32 %v624_v20, %v591_v5  ;;  %v821_v61 = vmul.f32 %v1308_v17, %v1884_v48  ;;  %v2288_v48 = vld [vmem:[%s2372_s4] ss:$0 sm:$0xff]  ;;  %p1475_p2 = pneg %p1474_p1 }
  0xbf   : > { %v853_v19 = vadd.f32 %v1959_v40, %v833_v49  ;;  %v688_v37 = vadd.f32 %v672_v4, %v639_v6 }
  0xc0   : > { %v868_v34 = vmax.f32 %v852_v15, 0.0  ;;  %v689_v16 = vadd.f32 %v673_v22, %v640_v31  ;;  %p1480_p7 = pnand %p1479_p6, %p1475_p2 }
  0xc1   : > { %v869_v35 = vmax.f32 %v853_v19, 0.0  ;;  %v738_v43 = vadd.f32 %v722_v27, %v688_v37 }
  0xc2   : > { %v739_v41 = vadd.f32 %v723_v10, %v689_v16 }
  0xc3   : > { %v879_v60 = vpack.c.bf16 %v869_v35, %v868_v34  ;;  %v787_v42 = vadd.f32 %v771_v51, %v738_v43 }
  0xc4   : > { %v788_v23 = vadd.f32 %v772_v53, %v739_v41 }
  0xc5   : > { %983 = vmatmul.bf16.gmra.mxu2 %v879_v60  ;;  %v836_v44 = vadd.f32 %v820_v0, %v787_v42 }
  0xc6   : > { %v837_v1 = vadd.f32 %v821_v61, %v788_v23 }
  0xc7   : > { %v856_v46 = vadd.f32 %v1959_v40, %v836_v44 }
  0xc8   : > { %v857_v30 = vadd.f32 %v1959_v40, %v837_v1 }
  0xc9   : > { %v872_v47 = vmax.f32 %v856_v46, 0.0 }
  0xca   : > { %v873_v29 = vmax.f32 %v857_v30, 0.0 }
  0xcc   : > { %v881_v54 = vpack.c.bf16 %v873_v29, %v872_v47 }
  0xce   : > { %993 = vmatmul.bf16.gmra.mxu3 %v881_v54 }
 0x10a   : > { %v959_v32 = vpop.f32.mrf.mxu0 }
 0x10b   : > { %v960_v12 = vadd.f32 %v2288_v48, %v959_v32 }
 0x10d   : > { %v999_v59 = vmax.f32 %v960_v12, 0.0 }
 0x10e   : > { %v969_v38 = vpop.f32.mrf.mxu1 }
 0x10f   : > { %1015 = vst [vmem:[%s1663_s15] sm:$0xff] %v999_v59  ;;  %v970_v40 = vadd.f32 %v2288_v48, %v969_v38 }
 0x111   : > { %v1003_v11 = vmax.f32 %v970_v40, 0.0 }
 0x112   : > { %v961_v36 = vpop.f32.mrf.mxu0 }
 0x113   : > { %1019 = vst [vmem:[%s1663_s15 + $0x20] sm:$0xff] %v1003_v11  ;;  %v962_v13 = vadd.f32 %v2288_v48, %v961_v36 }
 0x115   : > { %v1000_v55 = vmax.f32 %v962_v13, 0.0 }
 0x116   : > { %v971_v39 = vpop.f32.mrf.mxu1 }
 0x117   : > { %1016 = vst [vmem:[%s1663_s15 + $0x8] sm:$0xff] %v1000_v55  ;;  %v972_v2 = vadd.f32 %v2288_v48, %v971_v39 }
 0x119   : > { %v1004_v24 = vmax.f32 %v972_v2, 0.0 }
 0x11b   : > { %1020 = vst [vmem:[%s1663_s15 + $0x28] sm:$0xff] %v1004_v24 }
 0x120   : > { %v979_v18 = vpop.f32.mrf.mxu2 }
 0x121   : > { %v980_v45 = vadd.f32 %v2288_v48, %v979_v18 }
 0x123   : > { %v1007_v33 = vmax.f32 %v980_v45, 0.0 }
 0x125   : > { %1023 = vst [vmem:[%s1663_s15 + $0x40] sm:$0xff] %v1007_v33 }
 0x128   : > { %v981_v52 = vpop.f32.mrf.mxu2 }
 0x129   : > { %v982_v7 = vadd.f32 %v2288_v48, %v981_v52 }
 0x12b   : > { %v1008_v25 = vmax.f32 %v982_v7, 0.0  ;;  %v989_v14 = vpop.f32.mrf.mxu3 }
 0x12c   : > { %v990_v50 = vadd.f32 %v2288_v48, %v989_v14 }
 0x12d   : > { %1024 = vst [vmem:[%s1663_s15 + $0x48] sm:$0xff] %v1008_v25 }
 0x12e   : > { %v1011_v8 = vmax.f32 %v990_v50, 0.0  ;;  %v964_v57 = vpop.f32.mrf.mxu0 }
 0x12f   : > { %v965_v58 = vadd.f32 %v2288_v48, %v964_v57 }
 0x130   : > { %1027 = vst [vmem:[%s1663_s15 + $0x60] sm:$0xff] %v1011_v8 }
 0x131   : > { %v1001_v20 = vmax.f32 %v965_v58, 0.0 }
 0x133   : > { %v991_v62 = vpop.f32.mrf.mxu3  ;;  %1017 = vst [vmem:[%s1663_s15 + $0x10] sm:$0xff] %v1001_v20 }
 0x134   : > { %v992_v3 = vadd.f32 %v2288_v48, %v991_v62 }
 0x136   : > { %v1012_v4 = vmax.f32 %v992_v3, 0.0  ;;  %v966_v63 = vpop.f32.mrf.mxu0 }
 0x137   : > { %v974_v9 = vpop.f32.mrf.mxu1  ;;  %v967_v49 = vadd.f32 %v2288_v48, %v966_v63 }
 0x138   : > { %1028 = vst [vmem:[%s1663_s15 + $0x68] sm:$0xff] %v1012_v4  ;;  %v975_v5 = vadd.f32 %v2288_v48, %v974_v9 }
 0x139   : > { %v1002_v21 = vmax.f32 %v967_v49, 0.0 }
 0x13a   : > { %v1005_v22 = vmax.f32 %v975_v5, 0.0 }
 0x13b   : > { %1018 = vst [vmem:[%s1663_s15 + $0x18] sm:$0xff] %v1002_v21 }
 0x13c   : > { %1021 = vst [vmem:[%s1663_s15 + $0x30] sm:$0xff] %v1005_v22 }
 0x13f   : > { %v976_v56 = vpop.f32.mrf.mxu1 }
 0x140   : > { %v977_v6 = vadd.f32 %v2288_v48, %v976_v56 }
 0x142   : > { %v1006_v27 = vmax.f32 %v977_v6, 0.0 }
 0x144   : > { %1022 = vst [vmem:[%s1663_s15 + $0x38] sm:$0xff] %v1006_v27 }
 0x148   : > { %v984_v28 = vpop.f32.mrf.mxu2 }
 0x149   : > { %v985_v15 = vadd.f32 %v2288_v48, %v984_v28 }
 0x14b   : > { %v1009_v19 = vmax.f32 %v985_v15, 0.0 }
 0x14d   : > { %1025 = vst [vmem:[%s1663_s15 + $0x50] sm:$0xff] %v1009_v19 }
 0x150   : > { %v986_v31 = vpop.f32.mrf.mxu2 }
 0x151   : > { %v987_v10 = vadd.f32 %v2288_v48, %v986_v31  ;;  %v994_v26 = vpop.f32.mrf.mxu3 }
 0x152   : > { %v995_v37 = vadd.f32 %v2288_v48, %v994_v26 }
 0x153   : > { %v1010_v51 = vmax.f32 %v987_v10, 0.0 }
 0x154   : > { %v1013_v17 = vmax.f32 %v995_v37, 0.0 }
 0x155   : > { %1026 = vst [vmem:[%s1663_s15 + $0x58] sm:$0xff] %v1010_v51 }
 0x156   : > { %1029 = vst [vmem:[%s1663_s15 + $0x70] sm:$0xff] %v1013_v17 }
 0x159   : > { %v996_v34 = vpop.f32.mrf.mxu3 }
 0x15a   : > { %v997_v35 = vadd.f32 %v2288_v48, %v996_v34 }
 0x15c   : > { %v1014_v16 = vmax.f32 %v997_v35, 0.0 }
 0x15e   : > { %1030 = vst [vmem:[%s1663_s15 + $0x78] sm:$0xff] %v1014_v16 }
 0x15f   : > { %1483 = shalt.err (!%p1480_p7)
}
 0x160   : > { %s1554_s15 = smov 128   ;;  %s1555_s14 = smov 8  }
 0x161   : > { %1381 = dma.vmem_to_hbm [thread:$0]  (%p1637_p3), %s1047_s21, 2048, %s1049_s22, %s1032_s10, %s1554_s15, %s1554_s15, %s1555_s14  }
 0x162 PF: > { %p1387_p9 = scmp.ge.s32.totalorder %s1552_s25, 2  ;;  %s1063_s30 = sand.u32 1, %s1524_s18  }
 0x163   : > { %s1064_s9 = scalar_lea.sflag [#allocation5], %s1063_s30 }
 0x164   : > { %p1384_p10 = pnand %p1387_p9, %p1646_p8 }
 0x166   : > { %p1385_p11 = pneg %p1384_p10 }
 0x168   : > { %1519 = dma.done.wait (%p1385_p11), %s1064_s9, 2048  }
 0x169   : > { %1521 = vsyncadd (%p1385_p11), %s1064_s9, 4294965248  ;;  %s18_s25 = sadd.s32 1, %s1552_s25   ;;  %s2447_s6 = sld [smem:[#allocation10_spill]] }
 0x16a   : > { %p15_p12 = scmp.ge.s32.totalorder %s18_s25, 6   ;;  %s2448_s18 = smov %s1528_s19 }
 0x16b   : > { %s2449_s19 = smov %s1532_s20  ;;  %s2450_s20 = smov %s1655_s11 }
 0x16c   : > { %s2451_s21 = smov %s1544_s23  ;;  %s2452_s22 = smov %s1548_s24 }
 0x16d   : > { %s2453_s23 = smov %s2456_s28  ;;  %17 = sbr.rel (!%p15_p12) target bundleno = 5 (0x5), region = 149 }
 0x16f   : > { %s2454_s24 = smov %s2447_s6 }
 0x172   :  { %1070 = vsyncpa [#allocation5], 1 }
 0x173   :  { %1072 = vsyncpa [#allocation5 + $0x1], 1 }
 0x174   :  { %1073 = vsyncmov [#allocation3] }
 0x177   :  { %s1074_s7 = vpop.sfrf %1073 }
 0x178   :  { %p1347_p3 = scmp.ne.s32.totalorder %s1074_s7, 0 }
 0x17a   :  { %1078 = shalt.err (%p1347_p3)  }
 0x17b   :  { %1080 = vsyncmov [#allocation3 + $0x1] }
 0x17e   :  { %s1081_s12 = vpop.sfrf %1080 }
 0x17f   :  { %p1348_p8 = scmp.ne.s32.totalorder %s1081_s12, 0 }
 0x181   :  { %1085 = shalt.err (%p1348_p8)  }

</bundles_post_ra>
